<compile_context>
chip_gen: v7x
topology: tpu7x:2x2x1
jax: 0.10.0
libtpu: 0.0.40
codegen_flags: <defaults>
</compile_context>

<pallas_src>
import functools

import numpy as np
import jax
import jax.numpy as jnp
from jax import lax
from jax.experimental import pallas as pl
from jax.experimental.pallas import tpu as pltpu


def crossconv_kernel(x_ref, halo_ref, w1_ref, b1_ref, w2_ref, b2_ref, out_ref,
                     *, k, pad, add, h_total, matmul_dtype):
    """Fused CrossConv forward for one (batch, H-row-block) grid step.

    x_ref:    (1, TH, W, C1)        input row block (NHWC)
    halo_ref: (1, 1, 2*pad, W, C1)  pad rows above + below this block
    w1_ref:   (k*C1, C_)            cv1 (1,k) weights, tap-major, BN folded
    b1_ref:   (1, C_)               cv1 folded BN bias
    w2_ref:   (k*C_, C2)            cv2 (k,1) weights, tap-major, BN folded
    b2_ref:   (1, C2)               cv2 folded BN bias
    out_ref:  (1, TH, W, C2)
    """
    _, TH, W, C1 = x_ref.shape
    C_ = w1_ref.shape[1]
    C2 = w2_ref.shape[1]
    THp = TH + 2 * pad

    x_blk = x_ref[...].reshape(TH, W, C1)
    halo = halo_ref[...].reshape(2 * pad, W, C1)

    # Row window (with halo): image rows [hb*TH - pad, hb*TH + TH + pad).
    xwin = jnp.concatenate([halo[:pad], x_blk, halo[pad:]], axis=0)   # (THp, W, C1)

    # ---- cv1: (1,k) conv along W (zero padded) -> folded BN -> SiLU ----
    def shift_w(v, sh):
        # u[:, w, :] = v[:, w + sh, :]; zero-filled where w + sh is out of range.
        if sh == 0:
            return v
        z = jnp.zeros((v.shape[0], abs(sh), v.shape[2]), v.dtype)
        if sh > 0:
            return jnp.concatenate([v[:, sh:, :], z], axis=1)
        return jnp.concatenate([z, v[:, :v.shape[1] + sh, :]], axis=1)

    # im2col: all k taps in one matmul (contraction k*C1).
    cols1 = jnp.concatenate([shift_w(xwin, t - pad) for t in range(k)], axis=-1)
    a1 = jnp.dot(cols1.reshape(THp * W, k * C1).astype(matmul_dtype),
                 w1_ref[...].astype(matmul_dtype),
                 preferred_element_type=jnp.float32).reshape(THp, W, C_)
    a1 = a1 + b1_ref[...].reshape(1, 1, C_)
    y1 = a1 * jax.nn.sigmoid(a1)                                      # SiLU (f32)

    # Zero y1 rows lying outside the image so cv2 sees zero padding along H
    # (matches the PyTorch Conv2d padding of cv1's *output*).
    hb = pl.program_id(1)
    r = lax.broadcasted_iota(jnp.int32, (THp, 1, 1), 0)
    img_row = hb * TH + r - pad
    y1 = jnp.where((img_row >= 0) & (img_row < h_total), y1, 0.0)

    # ---- cv2: (k,1) conv along H -> folded BN -> SiLU ----
    cols2 = jnp.concatenate([y1[t:t + TH] for t in range(k)], axis=-1)  # (TH, W, k*C_)
    a2 = jnp.dot(cols2.reshape(TH * W, k * C_).astype(matmul_dtype),
                 w2_ref[...].astype(matmul_dtype),
                 preferred_element_type=jnp.float32).reshape(TH, W, C2)
    a2 = a2 + b2_ref[...].reshape(1, 1, C2)
    y2 = a2 * jax.nn.sigmoid(a2)

    if add:
        y2 = y2 + x_blk.astype(jnp.float32)

    out_ref[...] = y2.reshape(1, TH, W, C2).astype(out_ref.dtype)


def _pick_block_h(H, W, c_max, budget_bytes=2 << 20):
    """Largest divisor of H whose f32 row block stays under a per-buffer budget."""
    best = 1
    for th in range(1, H + 1):
        if H % th == 0 and (th == 1 or th * W * c_max * 4 <= budget_bytes):
            best = th
    return best


def make_crossconv_params(key, c1, c2, k=3, g=1, e=1.0):
    """Deterministic synthetic parameters, BN folded into conv weights (eval)."""
    assert g == 1, "grouped conv not implemented"
    c_ = int(c2 * e)
    eps = 1e-5  # BatchNorm2d default
    ks = jax.random.split(key, 12)

    # conv weights in PyTorch layout (c_out, c_in, kh, kw), bias=False
    w1_t = jax.random.normal(ks[0], (c_, c1, 1, k), jnp.float32) / np.sqrt(c1 * k)
    w2_t = jax.random.normal(ks[1], (c2, c_, k, 1), jnp.float32) / np.sqrt(c_ * k)

    # BatchNorm params / running stats (eval-mode folding)
    g1 = jax.random.uniform(ks[2], (c_,), minval=0.5, maxval=1.5)
    be1 = jax.random.normal(ks[3], (c_,)) * 0.1
    m1 = jax.random.normal(ks[4], (c_,)) * 0.1
    v1 = jax.random.uniform(ks[5], (c_,), minval=0.5, maxval=1.5)
    g2 = jax.random.uniform(ks[6], (c2,), minval=0.5, maxval=1.5)
    be2 = jax.random.normal(ks[7], (c2,)) * 0.1
    m2 = jax.random.normal(ks[8], (c2,)) * 0.1
    v2 = jax.random.uniform(ks[9], (c2,), minval=0.5, maxval=1.5)

    s1 = g1 / jnp.sqrt(v1 + eps)
    b1 = be1 - m1 * s1
    s2 = g2 / jnp.sqrt(v2 + eps)
    b2 = be2 - m2 * s2

    # tap-major layout, BN scale folded in:
    # cv1 kernel (1,k) -> taps along width:  (k, c1, c_)
    w1 = jnp.transpose(w1_t[:, :, 0, :], (2, 1, 0)) * s1[None, None, :]
    # cv2 kernel (k,1) -> taps along height: (k, c_, c2)
    w2 = jnp.transpose(w2_t[:, :, :, 0], (2, 1, 0)) * s2[None, None, :]

    return (w1.astype(jnp.float32), b1.reshape(1, c_).astype(jnp.float32),
            w2.astype(jnp.float32), b2.reshape(1, c2).astype(jnp.float32))


def crossconv_forward(x_nchw, params, *, k=3, shortcut=True, block_h=None,
                      matmul_dtype=jnp.float32):
    w1, b1, w2, b2 = params           # w1: (k, c1, c_), w2: (k, c_, c2)
    assert k % 2 == 1 and k >= 3, "kernel written for odd k >= 3"
    pad = k // 2
    c1 = x_nchw.shape[1]
    c_ = w1.shape[2]
    c2 = w2.shape[2]
    add = bool(shortcut and (c1 == c2))

    # NCHW -> NHWC (channels on the 128-lane axis).
    x = jnp.transpose(x_nchw, (0, 2, 3, 1)).astype(jnp.float32)
    N, H, W, _ = x.shape

    if block_h is None:
        block_h = _pick_block_h(H, W, max(c1, c_, c2))
    th = block_h
    assert H % th == 0 and th >= pad, (H, th, pad)
    nb = H // th

    # Pre-gather the 2*pad halo rows each H block needs for cv2 (zeros at the
    # image top/bottom). Tiny side input instead of overlapping BlockSpecs or a
    # full-tensor pad; only ~2*pad/th extra input traffic.
    xb = x.reshape(N, nb, th, W, c1)
    zrow = jnp.zeros((N, 1, pad, W, c1), x.dtype)
    top = jnp.concatenate([zrow, xb[:, :-1, th - pad:, :, :]], axis=1)
    bot = jnp.concatenate([xb[:, 1:, :pad, :, :], zrow], axis=1)
    halo = jnp.concatenate([top, bot], axis=2)            # (N, nb, 2*pad, W, c1)

    # Tap-major weights flattened for a single im2col matmul per conv.
    w1_2d = w1.reshape(k * c1, c_)
    w2_2d = w2.reshape(k * c_, c2)

    kernel = functools.partial(crossconv_kernel, k=k, pad=pad, add=add,
                               h_total=H, matmul_dtype=matmul_dtype)

    flops = 2 * N * H * W * k * (c1 * c_ + c_ * c2)
    transcendentals = N * H * W * (c_ + c2)
    bytes_accessed = 4 * (int(x.size) + int(halo.size) + N * H * W * c2
                          + int(w1_2d.size) + int(w2_2d.size)
                          + int(b1.size) + int(b2.size))

    out_nhwc = pl.pallas_call(
        kernel,
        out_shape=jax.ShapeDtypeStruct((N, H, W, c2), jnp.float32),
        grid_spec=pltpu.PrefetchScalarGridSpec(
            num_scalar_prefetch=0,
            grid=(N, nb),
            in_specs=[
                pl.BlockSpec((1, th, W, c1), lambda n, i: (n, i, 0, 0)),
                pl.BlockSpec((1, 1, 2 * pad, W, c1), lambda n, i: (n, i, 0, 0, 0)),
                pl.BlockSpec((k * c1, c_), lambda n, i: (0, 0)),
                pl.BlockSpec((1, c_), lambda n, i: (0, 0)),
                pl.BlockSpec((k * c_, c2), lambda n, i: (0, 0)),
                pl.BlockSpec((1, c2), lambda n, i: (0, 0)),
            ],
            out_specs=pl.BlockSpec((1, th, W, c2), lambda n, i: (n, i, 0, 0)),
        ),
        compiler_params=pltpu.CompilerParams(
            dimension_semantics=("parallel", "parallel"),
            vmem_limit_bytes=48 * 1024 * 1024,
        ),
        cost_estimate=pl.CostEstimate(flops=int(flops),
                                      transcendentals=int(transcendentals),
                                      bytes_accessed=int(bytes_accessed)),
    )(x, halo, w1_2d, b1, w2_2d, b2)

    return jnp.transpose(out_nhwc, (0, 3, 1, 2))          # back to NCHW


def _silu_np(x):
    return x / (1.0 + np.exp(-x))


def reference_crossconv_np(x_nchw, params, k, shortcut):
    """Pure numpy (float64) reference of the same forward pass."""
    w1, b1, w2, b2 = [np.asarray(p, np.float64) for p in params]
    x = np.transpose(np.asarray(x_nchw, np.float64), (0, 2, 3, 1))  # NHWC
    N, H, W, c1 = x.shape
    c_ = w1.shape[2]
    c2 = w2.shape[2]
    pad = k // 2

    xp = np.pad(x, ((0, 0), (0, 0), (pad, pad), (0, 0)))
    a1 = np.zeros((N, H, W, c_))
    for t in range(k):
        a1 += np.matmul(xp[:, :, t:t + W, :], w1[t])
    y1 = _silu_np(a1 + b1.reshape(1, 1, 1, c_))

    y1p = np.pad(y1, ((0, 0), (pad, pad), (0, 0), (0, 0)))
    a2 = np.zeros((N, H, W, c2))
    for t in range(k):
        a2 += np.matmul(y1p[:, t:t + H, :, :], w2[t])
    y2 = _silu_np(a2 + b2.reshape(1, 1, 1, c2))

    out = x + y2 if (shortcut and c1 == c2) else y2
    return np.transpose(out, (0, 3, 1, 2))  # NCHW


if __name__ == "__main__":
    # module config: c1=c2=4, k=3, s=1, g=1, e=1.0, shortcut=True  (so add=True)
    c1, c2, k = 4, 4, 3
    key = jax.random.PRNGKey(0)
    kx, kp = jax.random.split(key)

    x = jax.random.normal(kx, (2, c1, 16, 16), jnp.float32)   # NCHW like PyTorch
    params = make_crossconv_params(kp, c1, c2, k=k)

    # block_h=8 exercises the (N, H/block_h)=(2,2) grid and the halo path.
    out = crossconv_forward(x, params, k=k, shortcut=True, block_h=8)
    out = jax.block_until_ready(out)

    ref = reference_crossconv_np(np.asarray(x), params, k, shortcut=True)
    np.testing.assert_allclose(np.asarray(out), ref, rtol=2e-3, atol=2e-3)

    print("KERNEL_OK")
</pallas_src>

<mosaic_0001>
module attributes {stable_mosaic.version = 11 : i64} {
  func.func @crossconv_kernel(%arg0: i32, %arg1: i32, %arg2: memref<1x8x16x4xf32, #tpu.memory_space<vmem>>, %arg3: memref<1x1x2x16x4xf32, #tpu.memory_space<vmem>>, %arg4: memref<12x4xf32, #tpu.memory_space<vmem>>, %arg5: memref<1x4xf32, #tpu.memory_space<vmem>>, %arg6: memref<12x4xf32, #tpu.memory_space<vmem>>, %arg7: memref<1x4xf32, #tpu.memory_space<vmem>>, %arg8: memref<1x8x16x4xf32, #tpu.memory_space<vmem>>) attributes {dimension_semantics = [#tpu.dimension_semantics<parallel>, #tpu.dimension_semantics<parallel>], iteration_bounds = array<i64: 2, 2>, scalar_prefetch = 0 : i64, scratch_operands = 0 : i64, tpu.core_type = #tpu.core_type<tc>, window_params = [{transform_indices = @transform_0, window_bounds = array<i64: 1, 8, 16, 4>}, {transform_indices = @transform_1, window_bounds = array<i64: 1, 1, 2, 16, 4>}, {pipeline_mode = #tpu.pipeline_mode<synchronous>, transform_indices = @transform_2, window_bounds = array<i64: 12, 4>}, {pipeline_mode = #tpu.pipeline_mode<synchronous>, transform_indices = @transform_3, window_bounds = array<i64: 1, 4>}, {pipeline_mode = #tpu.pipeline_mode<synchronous>, transform_indices = @transform_4, window_bounds = array<i64: 12, 4>}, {pipeline_mode = #tpu.pipeline_mode<synchronous>, transform_indices = @transform_5, window_bounds = array<i64: 1, 4>}, {transform_indices = @transform_6, window_bounds = array<i64: 1, 8, 16, 4>}]} {
    %c0 = arith.constant 0 : index
    %c0_0 = arith.constant 0 : index
    %c0_1 = arith.constant 0 : index
    %c0_2 = arith.constant 0 : index
    %0 = vector.load %arg2[%c0, %c0_0, %c0_1, %c0_2] : memref<1x8x16x4xf32, #tpu.memory_space<vmem>>, vector<1x8x16x4xf32>
    %1 = vector.shape_cast %0 : vector<1x8x16x4xf32> to vector<8x16x4xf32>
    %c0_3 = arith.constant 0 : index
    %c0_4 = arith.constant 0 : index
    %c0_5 = arith.constant 0 : index
    %c0_6 = arith.constant 0 : index
    %c0_7 = arith.constant 0 : index
    %2 = vector.load %arg3[%c0_3, %c0_4, %c0_5, %c0_6, %c0_7] : memref<1x1x2x16x4xf32, #tpu.memory_space<vmem>>, vector<1x1x2x16x4xf32>
    %3 = vector.shape_cast %2 : vector<1x1x2x16x4xf32> to vector<2x16x4xf32>
    %4 = vector.extract_strided_slice %3 {offsets = [0, 0, 0], sizes = [1, 16, 4], strides = [1, 1, 1]} : vector<2x16x4xf32> to vector<1x16x4xf32>
    %5 = vector.extract_strided_slice %3 {offsets = [1, 0, 0], sizes = [1, 16, 4], strides = [1, 1, 1]} : vector<2x16x4xf32> to vector<1x16x4xf32>
    %6 = tpu.concatenate %4, %1, %5 in 0 : vector<1x16x4xf32>, vector<8x16x4xf32>, vector<1x16x4xf32> -> vector<10x16x4xf32>
    %cst = arith.constant 0.000000e+00 : f32
    %7 = vector.broadcast %cst : f32 to vector<10x1x4xf32>
    %8 = vector.extract_strided_slice %6 {offsets = [0, 0, 0], sizes = [10, 15, 4], strides = [1, 1, 1]} : vector<10x16x4xf32> to vector<10x15x4xf32>
    %9 = tpu.concatenate %7, %8 in 1 : vector<10x1x4xf32>, vector<10x15x4xf32> -> vector<10x16x4xf32>
    %cst_8 = arith.constant 0.000000e+00 : f32
    %10 = vector.broadcast %cst_8 : f32 to vector<10x1x4xf32>
    %11 = vector.extract_strided_slice %6 {offsets = [0, 1, 0], sizes = [10, 15, 4], strides = [1, 1, 1]} : vector<10x16x4xf32> to vector<10x15x4xf32>
    %12 = tpu.concatenate %11, %10 in 1 : vector<10x15x4xf32>, vector<10x1x4xf32> -> vector<10x16x4xf32>
    %13 = tpu.concatenate %9, %6, %12 in 2 : vector<10x16x4xf32>, vector<10x16x4xf32>, vector<10x16x4xf32> -> vector<10x16x12xf32>
    %14 = vector.shape_cast %13 : vector<10x16x12xf32> to vector<160x12xf32>
    %c0_9 = arith.constant 0 : index
    %c0_10 = arith.constant 0 : index
    %15 = vector.load %arg4[%c0_9, %c0_10] : memref<12x4xf32, #tpu.memory_space<vmem>>, vector<12x4xf32>
    %cst_11 = arith.constant dense<0.000000e+00> : vector<160x4xf32>
    %16 = tpu.matmul %14, %15, %cst_11 {dimension_numbers = #tpu.dot_dimension_numbers<[1], [0], [0], [1], [0, 0, 1, 1], [], []>} : vector<160x12xf32>, vector<12x4xf32>, vector<160x4xf32> -> vector<160x4xf32>
    %17 = vector.shape_cast %16 : vector<160x4xf32> to vector<10x16x4xf32>
    %c0_12 = arith.constant 0 : index
    %c0_13 = arith.constant 0 : index
    %18 = vector.load %arg5[%c0_12, %c0_13] : memref<1x4xf32, #tpu.memory_space<vmem>>, vector<1x4xf32>
    %19 = vector.shape_cast %18 : vector<1x4xf32> to vector<1x1x4xf32>
    %20 = vector.broadcast %19 : vector<1x1x4xf32> to vector<10x16x4xf32>
    %21 = arith.addf %17, %20 : vector<10x16x4xf32>
    %22 = arith.negf %21 : vector<10x16x4xf32>
    %23 = math.exp %22 : vector<10x16x4xf32>
    %cst_14 = arith.constant 1.000000e+00 : f32
    %24 = vector.broadcast %cst_14 : f32 to vector<10x16x4xf32>
    %25 = arith.addf %24, %23 : vector<10x16x4xf32>
    %26 = arith.divf %24, %25 : vector<10x16x4xf32>
    %27 = arith.mulf %21, %26 : vector<10x16x4xf32>
    %28 = tpu.iota {dimensions = array<i32: 0>} : vector<10x1x1xi32>
    %c8_i32 = arith.constant 8 : i32
    %29 = arith.muli %arg1, %c8_i32 : i32
    %30 = vector.broadcast %29 : i32 to vector<10x1x1xi32>
    %31 = arith.addi %30, %28 : vector<10x1x1xi32>
    %c1_i32 = arith.constant 1 : i32
    %32 = vector.broadcast %c1_i32 : i32 to vector<10x1x1xi32>
    %33 = arith.subi %31, %32 : vector<10x1x1xi32>
    %c0_i32 = arith.constant 0 : i32
    %34 = vector.broadcast %c0_i32 : i32 to vector<10x1x1xi32>
    %35 = arith.cmpi sge, %33, %34 : vector<10x1x1xi32>
    %c16_i32 = arith.constant 16 : i32
    %36 = vector.broadcast %c16_i32 : i32 to vector<10x1x1xi32>
    %37 = arith.cmpi slt, %33, %36 : vector<10x1x1xi32>
    %38 = arith.andi %35, %37 : vector<10x1x1xi1>
    %cst_15 = arith.constant 0.000000e+00 : f32
    %39 = vector.shape_cast %38 : vector<10x1x1xi1> to vector<10x1x1xi1>
    %40 = vector.broadcast %39 : vector<10x1x1xi1> to vector<10x16x4xi1>
    %41 = vector.broadcast %cst_15 : f32 to vector<10x16x4xf32>
    %42 = arith.select %40, %27, %41 : vector<10x16x4xi1>, vector<10x16x4xf32>
    %43 = vector.extract_strided_slice %42 {offsets = [0, 0, 0], sizes = [8, 16, 4], strides = [1, 1, 1]} : vector<10x16x4xf32> to vector<8x16x4xf32>
    %44 = vector.extract_strided_slice %42 {offsets = [1, 0, 0], sizes = [8, 16, 4], strides = [1, 1, 1]} : vector<10x16x4xf32> to vector<8x16x4xf32>
    %45 = vector.extract_strided_slice %42 {offsets = [2, 0, 0], sizes = [8, 16, 4], strides = [1, 1, 1]} : vector<10x16x4xf32> to vector<8x16x4xf32>
    %46 = tpu.concatenate %43, %44, %45 in 2 : vector<8x16x4xf32>, vector<8x16x4xf32>, vector<8x16x4xf32> -> vector<8x16x12xf32>
    %47 = vector.shape_cast %46 : vector<8x16x12xf32> to vector<128x12xf32>
    %c0_16 = arith.constant 0 : index
    %c0_17 = arith.constant 0 : index
    %48 = vector.load %arg6[%c0_16, %c0_17] : memref<12x4xf32, #tpu.memory_space<vmem>>, vector<12x4xf32>
    %cst_18 = arith.constant dense<0.000000e+00> : vector<128x4xf32>
    %49 = tpu.matmul %47, %48, %cst_18 {dimension_numbers = #tpu.dot_dimension_numbers<[1], [0], [0], [1], [0, 0, 1, 1], [], []>} : vector<128x12xf32>, vector<12x4xf32>, vector<128x4xf32> -> vector<128x4xf32>
    %50 = vector.shape_cast %49 : vector<128x4xf32> to vector<8x16x4xf32>
    %c0_19 = arith.constant 0 : index
    %c0_20 = arith.constant 0 : index
    %51 = vector.load %arg7[%c0_19, %c0_20] : memref<1x4xf32, #tpu.memory_space<vmem>>, vector<1x4xf32>
    %52 = vector.shape_cast %51 : vector<1x4xf32> to vector<1x1x4xf32>
    %53 = vector.broadcast %52 : vector<1x1x4xf32> to vector<8x16x4xf32>
    %54 = arith.addf %50, %53 : vector<8x16x4xf32>
    %55 = arith.negf %54 : vector<8x16x4xf32>
    %56 = math.exp %55 : vector<8x16x4xf32>
    %cst_21 = arith.constant 1.000000e+00 : f32
    %57 = vector.broadcast %cst_21 : f32 to vector<8x16x4xf32>
    %58 = arith.addf %57, %56 : vector<8x16x4xf32>
    %59 = arith.divf %57, %58 : vector<8x16x4xf32>
    %60 = arith.mulf %54, %59 : vector<8x16x4xf32>
    %61 = arith.addf %60, %1 : vector<8x16x4xf32>
    %62 = vector.shape_cast %61 : vector<8x16x4xf32> to vector<1x8x16x4xf32>
    %c0_22 = arith.constant 0 : index
    %c0_23 = arith.constant 0 : index
    %c0_24 = arith.constant 0 : index
    %c0_25 = arith.constant 0 : index
    %63 = vector.load %arg8[%c0_22, %c0_23, %c0_24, %c0_25] : memref<1x8x16x4xf32, #tpu.memory_space<vmem>>, vector<1x8x16x4xf32>
    tpu.vector_store %arg8[%c0_22, %c0_23, %c0_24, %c0_25], %62 {strides = array<i32>} : memref<1x8x16x4xf32, #tpu.memory_space<vmem>>, vector<1x8x16x4xf32>,
    return
  }
  func.func @transform_0(%arg0: i32, %arg1: i32) -> (i32, i32, i32, i32) {
    %c0_i32 = arith.constant 0 : i32
    %c0_i32_0 = arith.constant 0 : i32
    %c0_i32_1 = arith.constant 0 : i32
    return %arg0, %arg1, %c0_i32, %c0_i32_0 : i32, i32, i32, i32
  }
  func.func @transform_1(%arg0: i32, %arg1: i32) -> (i32, i32, i32, i32, i32) {
    %c0_i32 = arith.constant 0 : i32
    %c0_i32_0 = arith.constant 0 : i32
    %c0_i32_1 = arith.constant 0 : i32
    %c0_i32_2 = arith.constant 0 : i32
    return %arg0, %arg1, %c0_i32, %c0_i32_0, %c0_i32_1 : i32, i32, i32, i32, i32
  }
  func.func @transform_2(%arg0: i32, %arg1: i32) -> (i32, i32) {
    %c0_i32 = arith.constant 0 : i32
    %c0_i32_0 = arith.constant 0 : i32
    %c0_i32_1 = arith.constant 0 : i32
    return %c0_i32, %c0_i32_0 : i32, i32
  }
  func.func @transform_3(%arg0: i32, %arg1: i32) -> (i32, i32) {
    %c0_i32 = arith.constant 0 : i32
    %c0_i32_0 = arith.constant 0 : i32
    %c0_i32_1 = arith.constant 0 : i32
    return %c0_i32, %c0_i32_0 : i32, i32
  }
  func.func @transform_4(%arg0: i32, %arg1: i32) -> (i32, i32) {
    %c0_i32 = arith.constant 0 : i32
    %c0_i32_0 = arith.constant 0 : i32
    %c0_i32_1 = arith.constant 0 : i32
    return %c0_i32, %c0_i32_0 : i32, i32
  }
  func.func @transform_5(%arg0: i32, %arg1: i32) -> (i32, i32) {
    %c0_i32 = arith.constant 0 : i32
    %c0_i32_0 = arith.constant 0 : i32
    %c0_i32_1 = arith.constant 0 : i32
    return %c0_i32, %c0_i32_0 : i32, i32
  }
  func.func @transform_6(%arg0: i32, %arg1: i32) -> (i32, i32, i32, i32) {
    %c0_i32 = arith.constant 0 : i32
    %c0_i32_0 = arith.constant 0 : i32
    %c0_i32_1 = arith.constant 0 : i32
    return %arg0, %arg1, %c0_i32, %c0_i32_0 : i32, i32, i32, i32
  }
}

</mosaic_0001>

<bundles_post_ra>
// kernel: tpu_custom_call.1
= control target key start
LH: loop header
LB: loop body
LE: loop exit
PB: predicated region body
PF: predicated region fallthrough
CT: control target
= control target key end

     0   :  { %s2274_s21 = smov 0   ;;  %s2276_s22 = smov 0   ;;  %s3024_s0 = inlined_call_operand.vmem [shape: f32[2,16,16,4], index: 0, kind: input, shape index: {}]   ;;  %s3025_s1 = inlined_call_operand.vmem [shape: f32[2,2,2,16,4], index: 1, kind: input, shape index: {}]   ;;  %s3026_s2 = inlined_call_operand.vmem [shape: f32[12,4], index: 2, kind: input, shape index: {}]   ;;  %s3027_s3 = inlined_call_operand.vmem [shape: f32[1,4], index: 3, kind: input, shape index: {}]   ;;  %s3028_s4 = inlined_call_operand.vmem [shape: f32[12,4], index: 4, kind: input, shape index: {}]   ;;  %s3029_s5 = inlined_call_operand.vmem [shape: f32[1,4], index: 5, kind: input, shape index: {}]   ;;  %s3030_s6 = inlined_call_operand.vmem [shape: f32[2,16,16,4], index: 6, kind: output, shape index: {}]  }
   0x1   :  { %s2278_s23 = smov 0   ;;  %s2280_s24 = smov 0  }
   0x2   :  { %s2282_s25 = smov 0  }
   0x3 LB: > { %s25_s26 = sadd.s32 1, %s2226_s23  ;;  %s28_s27 = sadd.s32 1, %s2230_s24  ;;  %s2234_s25 = sphi %s2282_s25, %s16_s25   ;;  %s2230_s24 = sphi %s2280_s24, %s3040_s24   ;;  %s2226_s23 = sphi %s2278_s23, %s3039_s23   ;;  %s2222_s22 = sphi %s2276_s22, %s3038_s22   ;;  %s2218_s21 = sphi %s2274_s21, %s3037_s21  }
   0x4   : > { %p26_p0 = scmp.ge.s32.totalorder %s25_s26, 2  ;;  %p1777_p1 = scmp.ge.s32.totalorder %s2234_s25, 1 }
   0x5   : > { %p250_p2 = scmp.lt.s32.totalorder %s2234_s25, 5 }
   0x6   : > { %s3042_s26 = smov (%p26_p0, %s25_s26), 0  ;;  %s3044_s27 = smov (!%p26_p0, %s28_s27), %s2230_s24 }
   0x7   : > { %p251_p3 = pnand %p1777_p1, %p250_p2  ;;  %p30_p4 = scmp.ge.s32.totalorder %s3044_s27, 2 }
   0x8   : > { %p300_p5 = scmp.lt.s32.totalorder (!%p251_p3), %s2222_s22, 1  ;;  %p312_p6 = scmp.lt.s32.totalorder (!%p251_p3), %s2218_s21, 1  ;;  %v654_v0 = vld [vmem:[%s3026_s2] sm:$0xff] (!%p251_p3)  ;;  %v655_v1 = vld [vmem:[%s3026_s2 + $0x8] sm:$0xf] (!%p251_p3)  ;;  %vm717_vm0 = vcmask (!%p251_p3), 1043456  }
   0x9   : > { %s3046_s27 = smov (%p30_p4, %s3044_s27), 0  ;;  %254 = sbr.rel (%p251_p3) target bundleno = 827 (0x33b), region = 44 }
   0xa   : > { %s2304_s28 = sshll.u32 (!%p251_p3), %s2218_s21, 3  ;;  %v1979_v2 = vpack.c.bf16 (!%p251_p3), %v655_v1, %v654_v0  ;;  %vm2236_vm1 = vmmov (!%p251_p3), 1   ;;  %s2237_s18 = smov (!%p251_p3), 4   ;;  %vm370_vm3 = vcmask (!%p251_p3), 1040384   ;;  %vm431_vm4 = vcmask (!%p251_p3), 1046528  }
   0xb   : > { %p302_p7 = scmp.lt.s32.totalorder (!%p251_p3), %s2304_s28, 15  ;;  %vm2316_vm2 = vmpackc.low (!%p251_p3), %vm717_vm0, %vm2236_vm1  ;;  %s2238_s7 = smov (!%p251_p3), 8   ;;  %vm612_vm5 = vcmask (!%p251_p3), 31744   ;;  %vm633_vm6 = vcmask (!%p251_p3), 64512   ;;  %vm656_vm7 = vcmask (!%p251_p3), 97280  }
   0xc   : > { %1981 = vmatprep.subr.msk.bf16.mxu0 (!%p251_p3), %vm2316_vm2, %v1979_v2  ;;  %1991 = vmatprep.subr.msk.bf16.mxu1 (!%p251_p3), %vm2316_vm2, %v1979_v2 }
   0xd   : > { %1984 = vmatpush3.bf16.msk.msra.mxu0 (!%p251_p3), %vm2316_vm2, %v1979_v2  ;;  %1992 = vmatpush3.bf16.msk.msra.mxu1 (!%p251_p3), %vm2316_vm2, %v1979_v2 }
  0x10   : > { %s3048_s22 = smov (!%p300_p5, %s2222_s22), 1  ;;  %s3050_s21 = smov (!%p312_p6, %s2218_s21), 1 }
  0x11   : > { %s1783_s29 = sshll.u32 %s3048_s22, 3  ;;  %s1782_s30 = sshll.u32 %s3050_s21, 2 }
  0x12   : > { %s316_s11 = sadd.s32 %s1783_s29, %s1782_s30  ;;  %s1780_s16 = sshll.u32 %s3048_s22, 5 }
  0x13   : > { %s1784_s12 = sshll.u32 %s316_s11, 3 }
  0x14   : > { %s2323_s15 = scalar_lea.vmem %s3025_s1, %s1784_s12 }
  0x15   : > { %v2331_v4 = vld [vmem:[%s2323_s15] sm:$0xff]  ;;  %s303_s17 = scalar_select %p302_p7, %s2304_s28, 15  ;;  %v347_v5 = vld [vmem:[%s2323_s15 + $0x8] sm:$0xff]  ;;  %v2489_v60 = vld [vmem:[%s2323_s15 + $0x10] sm:$0xff] }
  0x16   : > { %482 = vrot.lane.b32.xlu0 %v2331_v4, %s2237_s18  ;;  %v371_v6 = vrot.slane %v2331_v4, 7  ;;  %v372_v7 = vrot.slane %v347_v5, 7  ;;  %v432_v9 = vrot.slane %v2331_v4, 1  ;;  %v433_v10 = vrot.slane %v347_v5, 1  ;;  %v2492_v61 = vld [vmem:[%s2323_s15 + $0x18] sm:$0xff] }
  0x17   : > { %s1779_s19 = sshll.u32 %s303_s17, 1  ;;  %v459_v62 = vrot.slane %v2489_v60, 1  ;;  %v460_v63 = vrot.slane %v2492_v61, 1 }
  0x18   : > { %s2344_s20 = sadd.s32 %s1780_s16, %s1779_s19  ;;  %v2349_v8 = vsel %vm370_vm3, %v371_v6, %v372_v7  ;;  %v434_v15 = vsel %vm431_vm4, %v432_v9, %v433_v10  ;;  %v472_v19 = vsel %vm431_vm4, %v433_v10, 0.0  ;;  %v421_v10 = vsel %vm370_vm3, 0.0, %v371_v6 }
  0x19   : > { %s1781_s21 = sshll.u32 %s2344_s20, 3  ;;  %v461_v1 = vsel %vm431_vm4, %v459_v62, %v460_v63  ;;  %v481_v2 = vsel %vm431_vm4, %v460_v63, 0.0 }
  0x1a   : > { %s2358_s30 = scalar_lea.vmem %s3024_s0, %s1781_s21  ;;  %484 = vrot.lane.b32.xlu0 %v347_v5, %s2237_s18  ;;  %s2923_s17 = scalar_lea.vmem %s3030_s6, %s1781_s21 }
  0x1b   : > { %v2362_v11 = vld [vmem:[%s2358_s30 + $0x8] sm:$0xff]  ;;  %v2365_v12 = vld [vmem:[%s2358_s30] sm:$0xff]  ;;  %v2377_v17 = vld [vmem:[%s2358_s30 + $0x10] sm:$0xff] }
  0x1c   : > { %488 = vrot.lane.b32.xlu1 %v2362_v11, %s2237_s18  ;;  %v435_v13 = vrot.slane %v2365_v12, 1  ;;  %v436_v14 = vrot.slane %v2362_v11, 1  ;;  %v2380_v18 = vld [vmem:[%s2358_s30 + $0x18] sm:$0xff]  ;;  %v438_v20 = vrot.slane %v2377_v17, 1  ;;  %v2393_v24 = vld [vmem:[%s2358_s30 + $0x20] sm:$0xff]  ;;  %v2396_v25 = vld [vmem:[%s2358_s30 + $0x28] sm:$0xff] }
  0x1d   : > { %v439_v21 = vrot.slane %v2380_v18, 1  ;;  %v441_v26 = vrot.slane %v2393_v24, 1  ;;  %v442_v27 = vrot.slane %v2396_v25, 1  ;;  %v2409_v30 = vld [vmem:[%s2358_s30 + $0x30] sm:$0xff]  ;;  %v2412_v31 = vld [vmem:[%s2358_s30 + $0x38] sm:$0xff]  ;;  %v2425_v36 = vld [vmem:[%s2358_s30 + $0x40] sm:$0xff] }
  0x1e   : > { %486 = vrot.lane.b32.xlu0 %v2365_v12, %s2237_s18  ;;  %v437_v16 = vsel %vm431_vm4, %v435_v13, %v436_v14  ;;  %v473_v22 = vsel %vm431_vm4, %v436_v14, 0.0  ;;  %v444_v32 = vrot.slane %v2409_v30, 1  ;;  %v445_v33 = vrot.slane %v2412_v31, 1  ;;  %v2428_v37 = vld [vmem:[%s2358_s30 + $0x48] sm:$0xff]  ;;  %v2441_v42 = vld [vmem:[%s2358_s30 + $0x50] sm:$0xff]  ;;  %v2444_v43 = vld [vmem:[%s2358_s30 + $0x58] sm:$0xff] }
  0x1f   : > { %v440_v23 = vsel %vm431_vm4, %v438_v20, %v439_v21  ;;  %v474_v28 = vsel %vm431_vm4, %v439_v21, 0.0  ;;  %v443_v29 = vsel %vm431_vm4, %v441_v26, %v442_v27  ;;  %v475_v34 = vsel %vm431_vm4, %v442_v27, 0.0  ;;  %v2457_v48 = vld [vmem:[%s2358_s30 + $0x60] sm:$0xff]  ;;  %v2460_v49 = vld [vmem:[%s2358_s30 + $0x68] sm:$0xff]  ;;  %v2473_v54 = vld [vmem:[%s2358_s30 + $0x70] sm:$0xff] }
  0x20   : > { %552 = vrot.lane.b32.xlu1 %v434_v15, %s2238_s7  ;;  %v446_v35 = vsel %vm431_vm4, %v444_v32, %v445_v33  ;;  %v447_v38 = vrot.slane %v2425_v36, 1  ;;  %v448_v39 = vrot.slane %v2428_v37, 1  ;;  %v476_v40 = vsel %vm431_vm4, %v445_v33, 0.0  ;;  %v2476_v55 = vld [vmem:[%s2358_s30 + $0x78] sm:$0xff] }
  0x21   : > { %v450_v44 = vrot.slane %v2441_v42, 1  ;;  %v451_v45 = vrot.slane %v2444_v43, 1  ;;  %v453_v50 = vrot.slane %v2457_v48, 1  ;;  %v454_v51 = vrot.slane %v2460_v49, 1 }
  0x22   : > { %556 = vrot.lane.b32.xlu0 %v437_v16, %s2238_s7  ;;  %v449_v41 = vsel %vm431_vm4, %v447_v38, %v448_v39  ;;  %v477_v46 = vsel %vm431_vm4, %v448_v39, 0.0  ;;  %v456_v56 = vrot.slane %v2473_v54, 1  ;;  %v457_v57 = vrot.slane %v2476_v55, 1 }
  0x23   : > { %v452_v47 = vsel %vm431_vm4, %v450_v44, %v451_v45  ;;  %v478_v52 = vsel %vm431_vm4, %v451_v45, 0.0  ;;  %v455_v53 = vsel %vm431_vm4, %v453_v50, %v454_v51  ;;  %v479_v58 = vsel %vm431_vm4, %v454_v51, 0.0 }
  0x24   : > { %554 = vrot.lane.b32.xlu1 %v472_v19, %s2238_s7  ;;  %v458_v59 = vsel %vm431_vm4, %v456_v56, %v457_v57  ;;  %v480_v0 = vsel %vm431_vm4, %v457_v57, 0.0  ;;  %v374_v13 = vrot.slane %v2365_v12, 7  ;;  %v375_v20 = vrot.slane %v2362_v11, 7 }
  0x25   : > { %v377_v6 = vrot.slane %v2377_v17, 7  ;;  %v378_v33 = vrot.slane %v2380_v18, 7  ;;  %v380_v39 = vrot.slane %v2393_v24, 7  ;;  %v384_v63 = vrot.slane %v2412_v31, 7 }
  0x26   : > { %490 = vrot.lane.b32.xlu0 %v2377_v17, %s2237_s18  ;;  %v422_v19 = vsel %vm370_vm3, 0.0, %v374_v13  ;;  %v376_v27 = vsel %vm370_vm3, %v374_v13, %v375_v20 }
  0x27   : > { %v424_v45 = vsel %vm370_vm3, 0.0, %v380_v39 }
  0x28   : > { %558 = vrot.lane.b32.xlu1 %v473_v22, %s2238_s7 }
  0x2a   : > { %560 = vrot.lane.b32.xlu0 %v440_v23, %s2238_s7 }
  0x2c   : > { %492 = vrot.lane.b32.xlu1 %v2380_v18, %s2237_s18 }
  0x2e   : > { %494 = vrot.lane.b32.xlu0 %v2393_v24, %s2237_s18 }
  0x30   : > { %562 = vrot.lane.b32.xlu1 %v474_v28, %s2238_s7 }
  0x32   : > { %564 = vrot.lane.b32.xlu0 %v443_v29, %s2238_s7  ;;  %v423_v29 = vsel %vm370_vm3, 0.0, %v377_v6 }
  0x34   : > { %496 = vrot.lane.b32.xlu1 %v2396_v25, %s2237_s18 }
  0x36   : > { %498 = vrot.lane.b32.xlu0 %v2409_v30, %s2237_s18 }
  0x38   : > { %566 = vrot.lane.b32.xlu1 %v475_v34, %s2238_s7 }
  0x3a   : > { %568 = vrot.lane.b32.xlu0 %v446_v35, %s2238_s7 }
  0x3c   : > { %500 = vrot.lane.b32.xlu1 %v2412_v31, %s2237_s18 }
  0x3e   : > { %502 = vrot.lane.b32.xlu0 %v2425_v36, %s2237_s18 }
  0x40   : > { %570 = vrot.lane.b32.xlu1 %v476_v40, %s2238_s7 }
  0x42   : > { %572 = vrot.lane.b32.xlu0 %v449_v41, %s2238_s7  ;;  %v379_v41 = vsel %vm370_vm3, %v377_v6, %v378_v33 }
  0x44   : > { %504 = vrot.lane.b32.xlu1 %v2428_v37, %s2237_s18 }
  0x46   : > { %506 = vrot.lane.b32.xlu0 %v2441_v42, %s2237_s18 }
  0x48   : > { %574 = vrot.lane.b32.xlu1 %v477_v46, %s2238_s7 }
  0x4a   : > { %576 = vrot.lane.b32.xlu0 %v452_v47, %s2238_s7  ;;  %v381_v47 = vrot.slane %v2396_v25, 7 }
  0x4c   : > { %508 = vrot.lane.b32.xlu1 %v2444_v43, %s2237_s18  ;;  %v382_v57 = vsel %vm370_vm3, %v380_v39, %v381_v47 }
  0x4e   : > { %510 = vrot.lane.b32.xlu0 %v2457_v48, %s2237_s18 }
  0x50   : > { %578 = vrot.lane.b32.xlu1 %v478_v52, %s2238_s7 }
  0x52   : > { %580 = vrot.lane.b32.xlu0 %v455_v53, %s2238_s7  ;;  %v383_v53 = vrot.slane %v2409_v30, 7 }
  0x54   : > { %512 = vrot.lane.b32.xlu1 %v2460_v49, %s2237_s18 }
  0x56   : > { %514 = vrot.lane.b32.xlu0 %v2473_v54, %s2237_s18 }
  0x58   : > { %582 = vrot.lane.b32.xlu1 %v479_v58, %s2238_s7 }
  0x5a   : > { %584 = vrot.lane.b32.xlu0 %v458_v59, %s2238_s7  ;;  %v425_v59 = vsel %vm370_vm3, 0.0, %v383_v53 }
  0x5c   : > { %516 = vrot.lane.b32.xlu1 %v2476_v55, %s2237_s18 }
  0x5e   : > { %518 = vrot.lane.b32.xlu0 %v2489_v60, %s2237_s18 }
  0x60   : > { %586 = vrot.lane.b32.xlu1 %v480_v0, %s2238_s7 }
  0x62   : > { %588 = vrot.lane.b32.xlu0 %v461_v1, %s2238_s7 }
  0x64   : > { %520 = vrot.lane.b32.xlu1 %v2492_v61, %s2237_s18 }
  0x68   : > { %590 = vrot.lane.b32.xlu1 %v481_v2, %s2238_s7 }
  0x88   : > { %v483_v5 = vpop.permute.xlu0 %482 }
  0x89   : > { %v613_v15 = vsel %vm612_vm5, %v421_v10, %v483_v5  ;;  %v386_v5 = vrot.slane %v2425_v36, 7 }
  0x8b   : > { %v426_v13 = vsel %vm370_vm3, 0.0, %v386_v5 }
  0x8c   : > { %v485_v7 = vpop.permute.xlu0 %484 }
  0x8d   : > { %v614_v12 = vsel %vm612_vm5, %v2349_v8, %v485_v7 }
  0x8e   : > { %v489_v9 = vpop.permute.xlu1 %488 }
  0x8f   : > { %v616_v32 = vsel %vm612_vm5, %v376_v27, %v489_v9  ;;  %v385_v9 = vsel %vm370_vm3, %v383_v53, %v384_v63 }
  0x90   : > { %v487_v14 = vpop.permute.xlu0 %486 }
  0x91   : > { %v615_v4 = vsel %vm612_vm5, %v422_v19, %v487_v14 }
  0x92   : > { %v553_v16 = vpop.permute.xlu1 %552 }
  0x93   : > { %v634_v21 = vsel %vm633_vm6, %v613_v15, %v553_v16  ;;  %v387_v15 = vrot.slane %v2428_v37, 7 }
  0x94   : > { %1921 = vmatprep.mubr.msk.f32.mxu0 %vm656_vm7, %v634_v21  ;;  %v557_v22 = vpop.permute.xlu0 %556  ;;  %v389_v21 = vrot.slane %v2441_v42, 7 }
  0x95   : > { %v636_v26 = vsel %vm633_vm6, %v615_v4, %v557_v22  ;;  %v388_v4 = vsel %vm370_vm3, %v386_v5, %v387_v15 }
  0x96   : > { %v555_v23 = vpop.permute.xlu1 %554 }
  0x97   : > { %v635_v28 = vsel %vm633_vm6, %v614_v12, %v555_v23  ;;  %v427_v12 = vsel %vm370_vm3, 0.0, %v389_v21 }
  0x98   : > { %1922 = vmatmul.mubr.msk.f32.vlgmr.msra.gmra.mrb[0].mxu0 %vm656_vm7, %v635_v28  ;;  %v491_v11 = vpop.permute.xlu0 %490 }
  0x99   : > { %1924 = vmatprep.mubr.msk.f32.mxu0 %vm656_vm7, %v636_v26  ;;  %v617_v34 = vsel %vm612_vm5, %v423_v29, %v491_v11  ;;  %v390_v26 = vrot.slane %v2444_v43, 7  ;;  %v392_v29 = vrot.slane %v2457_v48, 7 }
  0x9a   : > { %v559_v17 = vpop.permute.xlu1 %558 }
  0x9b   : > { %v637_v8 = vsel %vm633_vm6, %v616_v32, %v559_v17  ;;  %v391_v17 = vsel %vm370_vm3, %v389_v21, %v390_v26 }
  0x9c   : > { %1925 = vmatmul.mubr.msk.f32.gmra.mrb[2].mxu0 %vm656_vm7, %v637_v8  ;;  %v561_v35 = vpop.permute.xlu0 %560  ;;  %v428_v8 = vsel %vm370_vm3, 0.0, %v392_v29 }
  0x9d   : > { %v638_v38 = vsel %vm633_vm6, %v617_v34, %v561_v35  ;;  %v393_v35 = vrot.slane %v2460_v49, 7 }
  0x9e   : > { %v493_v40 = vpop.permute.xlu1 %492  ;;  %1927 = vmatprep.mubr.msk.f32.mxu0 %vm656_vm7, %v638_v38 }
  0x9f   : > { %v618_v18 = vsel %vm612_vm5, %v379_v41, %v493_v40  ;;  %v395_v41 = vrot.slane %v2473_v54, 7 }
  0xa0   : > { %v495_v44 = vpop.permute.xlu0 %494 }
  0xa1   : > { %v619_v51 = vsel %vm612_vm5, %v424_v45, %v495_v44  ;;  %v394_v45 = vsel %vm370_vm3, %v392_v29, %v393_v35  ;;  %v2643_v35 = vstv %s2304_s28 }
  0xa2   : > { %v563_v46 = vpop.permute.xlu1 %562  ;;  %vm1073_vm8 = vcmp.ge.s32.totalorder %v2643_v35, 0  ;;  %vm1083_vm9 = vcmp.lt.s32.totalorder %v2643_v35, 16 }
  0xa3   : > { %v639_v50 = vsel %vm633_vm6, %v618_v18, %v563_v46  ;;  %v429_v46 = vsel %vm370_vm3, 0.0, %v395_v41  ;;  %vm1093_vm10 = vmand %vm1073_vm8, %vm1083_vm9 }
  0xa4   : > { %1928 = vmatmul.mubr.msk.f32.gmra.mrb[4].mxu0 %vm656_vm7, %v639_v50  ;;  %v565_v24 = vpop.permute.xlu0 %564  ;;  %v396_v50 = vrot.slane %v2476_v55, 7 }
  0xa5   : > { %v640_v52 = vsel %vm633_vm6, %v619_v51, %v565_v24 }
  0xa6   : > { %v497_v56 = vpop.permute.xlu1 %496  ;;  %1930 = vmatprep.mubr.msk.f32.mxu0 %vm656_vm7, %v640_v52  ;;  %v398_v52 = vrot.slane %v2489_v60, 7 }
  0xa7   : > { %v620_v25 = vsel %vm612_vm5, %v382_v57, %v497_v56  ;;  %v397_v57 = vsel %vm370_vm3, %v395_v41, %v396_v50 }
  0xa8   : > { %v499_v58 = vpop.permute.xlu0 %498 }
  0xa9   : > { %v621_v1 = vsel %vm612_vm5, %v425_v59, %v499_v58  ;;  %v430_v59 = vsel %vm370_vm3, 0.0, %v398_v52 }
  0xaa   : > { %v567_v62 = vpop.permute.xlu1 %566 }
  0xab   : > { %v641_v0 = vsel %vm633_vm6, %v620_v25, %v567_v62  ;;  %v399_v62 = vrot.slane %v2492_v61, 7 }
  0xac   : > { %1931 = vmatmul.mubr.msk.f32.gmra.mrb[6].mxu0 %vm656_vm7, %v641_v0  ;;  %v569_v30 = vpop.permute.xlu0 %568 }
  0xad   : > { %v642_v2 = vsel %vm633_vm6, %v621_v1, %v569_v30 }
  0xae   : > { %v501_v7 = vpop.permute.xlu1 %500  ;;  %1933 = vmatprep.mubr.msk.f32.mxu0 %vm656_vm7, %v642_v2  ;;  %v400_v2 = vsel %vm370_vm3, %v398_v52, %v399_v62  ;;  %v1056_v62 = vadd.s32 3, %v2643_v35 }
  0xaf   : > { %v622_v31 = vsel %vm612_vm5, %v385_v9, %v501_v7 }
  0xb0   : > { %v503_v10 = vpop.permute.xlu0 %502 }
  0xb1   : > { %v623_v19 = vsel %vm612_vm5, %v426_v13, %v503_v10  ;;  %v2616_v13 = vld [vmem:[%s3027_s3] ss:$0 sm:$0xff] }
  0xb2   : > { %v571_v14 = vpop.permute.xlu1 %570 }
  0xb3   : > { %v643_v16 = vsel %vm633_vm6, %v622_v31, %v571_v14 }
  0xb4   : > { %1934 = vmatmul.mubr.msk.f32.gmra.mrb[8].mxu0 %vm656_vm7, %v643_v16  ;;  %v573_v36 = vpop.permute.xlu0 %572 }
  0xb5   : > { %v644_v20 = vsel %vm633_vm6, %v623_v19, %v573_v36 }
  0xb6   : > { %v505_v22 = vpop.permute.xlu1 %504  ;;  %1936 = vmatprep.mubr.msk.f32.mxu0 %vm656_vm7, %v644_v20 }
  0xb7   : > { %v624_v37 = vsel %vm612_vm5, %v388_v4, %v505_v22 }
  0xb8   : > { %v507_v6 = vpop.permute.xlu0 %506 }
  0xb9   : > { %v625_v28 = vsel %vm612_vm5, %v427_v12, %v507_v6 }
  0xba   : > { %v575_v23 = vpop.permute.xlu1 %574 }
  0xbb   : > { %v645_v27 = vsel %vm633_vm6, %v624_v37, %v575_v23 }
  0xbc   : > { %1937 = vmatmul.mubr.msk.f32.gmra.mrb[10].mxu0 %vm656_vm7, %v645_v27  ;;  %v577_v42 = vpop.permute.xlu0 %576 }
  0xbd   : > { %v646_v11 = vsel %vm633_vm6, %v625_v28, %v577_v42 }
  0xbe   : > { %v509_v32 = vpop.permute.xlu1 %508  ;;  %1939 = vmatprep.mubr.msk.f32.mxu0 %vm656_vm7, %v646_v11 }
  0xbf   : > { %v626_v43 = vsel %vm612_vm5, %v391_v17, %v509_v32 }
  0xc0   : > { %v511_v33 = vpop.permute.xlu0 %510 }
  0xc1   : > { %v627_v39 = vsel %vm612_vm5, %v428_v8, %v511_v33  ;;  %v1288_v33 = vld [vmem:[%s3028_s4] sm:$0xff]  ;;  %v1289_v8 = vld [vmem:[%s3028_s4 + $0x8] sm:$0xf] }
  0xc2   : > { %v579_v34 = vpop.permute.xlu1 %578 }
  0xc3   : > { %v647_v38 = vsel %vm633_vm6, %v626_v43, %v579_v34  ;;  %v1985_v43 = vpack.c.bf16 %v1289_v8, %v1288_v33 }
  0xc4   : > { %1940 = vmatmul.mubr.msk.f32.gmra.mrb[12].mxu0 %vm656_vm7, %v647_v38  ;;  %v581_v48 = vpop.permute.xlu0 %580 }
  0xc5   : > { %v648_v40 = vsel %vm633_vm6, %v627_v39, %v581_v48  ;;  %1987 = vmatprep.subr.msk.bf16.mxu1 %vm2316_vm2, %v1985_v43  ;;  %v1055_v48 = vadd.s32 2, %v2643_v35 }
  0xc6   : > { %v513_v44 = vpop.permute.xlu1 %512  ;;  %1942 = vmatprep.mubr.msk.f32.mxu0 %vm656_vm7, %v648_v40 }
  0xc7   : > { %v628_v49 = vsel %vm612_vm5, %v394_v45, %v513_v44 }
  0xc8   : > { %v515_v18 = vpop.permute.xlu0 %514 }
  0xc9   : > { %v629_v24 = vsel %vm612_vm5, %v429_v46, %v515_v18 }
  0xca   : > { %v583_v47 = vpop.permute.xlu1 %582 }
  0xcb   : > { %v649_v51 = vsel %vm633_vm6, %v628_v49, %v583_v47  ;;  %v1833_v47 = vadd.s32 4294967295, %v1055_v48 }
  0xcc   : > { %1943 = vmatmul.mubr.msk.f32.gmra.mrb[14].mxu0 %vm656_vm7, %v649_v51  ;;  %v585_v54 = vpop.permute.xlu0 %584 }
  0xcd   : > { %v650_v53 = vsel %vm633_vm6, %v629_v24, %v585_v54  ;;  %vm1074_vm11 = vcmp.ge.s32.totalorder %v1833_v47, 0  ;;  %vm1084_vm12 = vcmp.lt.s32.totalorder %v1833_v47, 16 }
  0xce   : > { %v517_v56 = vpop.permute.xlu1 %516  ;;  %1945 = vmatprep.mubr.msk.f32.mxu0 %vm656_vm7, %v650_v53  ;;  %vm2677_vm13 = vmand %vm1074_vm11, %vm1084_vm12 }
  0xcf   : > { %v630_v55 = vsel %vm612_vm5, %v397_v57, %v517_v56 }
  0xd0   : > { %v519_v58 = vpop.permute.xlu0 %518 }
  0xd1   : > { %v631_v60 = vsel %vm612_vm5, %v430_v59, %v519_v58 }
  0xd2   : > { %v587_v25 = vpop.permute.xlu1 %586 }
  0xd3   : > { %v651_v63 = vsel %vm633_vm6, %v630_v55, %v587_v25 }
  0xd4   : > { %1946 = vmatmul.mubr.msk.f32.gmra.mrb[16].mxu0 %vm656_vm7, %v651_v63  ;;  %v589_v0 = vpop.permute.xlu0 %588 }
  0xd5   : > { %v652_v1 = vsel %vm633_vm6, %v631_v60, %v589_v0 }
  0xd6   : > { %v521_v30 = vpop.permute.xlu1 %520  ;;  %1948 = vmatprep.mubr.msk.f32.mxu1 %vm656_vm7, %v652_v1 }
  0xd7   : > { %v632_v5 = vsel %vm612_vm5, %v400_v2, %v521_v30 }
  0xda   : > { %v591_v7 = vpop.permute.xlu1 %590 }
  0xdb   : > { %v653_v9 = vsel %vm633_vm6, %v632_v5, %v591_v7  ;;  %v1834_v5 = vadd.s32 4294967295, %v1056_v62 }
  0xdc   : > { %1949 = vmatmul.mubr.msk.f32.vlgmr.msra.gmra.mrb[0].mxu1 %vm656_vm7, %v653_v9 }
  0xdd   : > { %1990 = vmatpush3.bf16.msk.msra.mxu1 %vm2316_vm2, %v1985_v43  ;;  %vm1075_vm14 = vcmp.ge.s32.totalorder %v1834_v5, 0  ;;  %vm1085_vm15 = vcmp.lt.s32.totalorder %v1834_v5, 16 }
  0xde   : > { %vm1095_vm0 = vmand %vm1075_vm14, %vm1085_vm15 }
 0x16b   : > { %v2609_v61 = vpop.f32.mrb[0].mxu0 }
 0x16c   : > { %v2611_v10 = vpop.f32.mrb[1].mxu0 }
 0x16f   : > { %v1926_v31 = vpop.f32.mrb[2].mxu0 }
 0x170   : > { %v896_v14 = vadd.f32 %v1926_v31, %v2616_v13  ;;  %v797_v15 = vpop.f32.mrb[3].mxu0 }
 0x171   : > { %v895_v16 = vadd.f32 %v2616_v13, %v797_v15 }
 0x172   : > { %v1814_v19 = vmul.f32 -1.442695, %v896_v14 }
 0x173   : > { %v1813_v36 = vmul.f32 -1.442695, %v895_v16 }
 0x174   : > { %2036 = vpow2.f32 %v1814_v19 }
 0x175   : > { %2038 = vpow2.f32 %v1813_v36 }
 0x177   : > { %v1929_v20 = vpop.f32.mrb[4].mxu0 }
 0x178   : > { %v2621_v21 = vadd.f32 %v1929_v20, %v2616_v13  ;;  %v807_v22 = vpop.f32.mrb[5].mxu0 }
 0x179   : > { %v2624_v4 = vadd.f32 %v2616_v13, %v807_v22 }
 0x17a   : > { %v1816_v6 = vmul.f32 -1.442695, %v2621_v21 }
 0x17b   : > { %v1815_v12 = vmul.f32 -1.442695, %v2624_v4 }
 0x17c   : > { %2040 = vpow2.f32 %v1816_v6 }
 0x17d   : > { %2042 = vpow2.f32 %v1815_v12 }
 0x17e   : > { %v2037_v37 = vpop.eup %2036 }
 0x17f   : > { %v2039_v23 = vpop.eup %2038  ;;  %v976_v26 = vadd.f32 1.0, %v2037_v37  ;;  %v1932_v27 = vpop.f32.mrb[6].mxu0 }
 0x180   : > { %v975_v28 = vadd.f32 1.0, %v2039_v23  ;;  %v2629_v42 = vadd.f32 %v1932_v27, %v2616_v13  ;;  %v817_v11 = vpop.f32.mrb[7].mxu0 }
 0x181   : > { %2044 = vrcp.f32 %v976_v26  ;;  %v2632_v29 = vadd.f32 %v2616_v13, %v817_v11 }
 0x182   : > { %2046 = vrcp.f32 %v975_v28  ;;  %v1818_v32 = vmul.f32 -1.442695, %v2629_v42 }
 0x183   : > { %v1817_v17 = vmul.f32 -1.442695, %v2632_v29 }
 0x184   : > { %2048 = vpow2.f32 %v1818_v32 }
 0x185   : > { %2050 = vpow2.f32 %v1817_v17 }
 0x186   : > { %v2041_v34 = vpop.eup %2040 }
 0x187   : > { %v978_v38 = vadd.f32 1.0, %v2041_v34  ;;  %v1935_v39 = vpop.f32.mrb[8].mxu0  ;;  %v2043_v44 = vpop.eup %2042 }
 0x188   : > { %v2651_v40 = vadd.f32 %v1935_v39, %v2616_v13  ;;  %v827_v41 = vpop.f32.mrb[9].mxu0  ;;  %v977_v18 = vadd.f32 1.0, %v2043_v44 }
 0x189   : > { %2052 = vrcp.f32 %v978_v38  ;;  %v2656_v45 = vadd.f32 %v2616_v13, %v827_v41 }
 0x18a   : > { %v1820_v46 = vmul.f32 -1.442695, %v2651_v40  ;;  %2054 = vrcp.f32 %v977_v18 }
 0x18b   : > { %v2045_v49 = vpop.eup %2044  ;;  %v1819_v3 = vmul.f32 -1.442695, %v2656_v45 }
 0x18c   : > { %v2047_v50 = vpop.eup %2046  ;;  %v1036_v51 = vmul.f32 %v2045_v49, %v896_v14  ;;  %2056 = vpow2.f32 %v1820_v46 }
 0x18d   : > { %v1035_v24 = vmul.f32 %v2047_v50, %v895_v16  ;;  %2058 = vpow2.f32 %v1819_v3 }
 0x18e   : > { %v2049_v54 = vpop.eup %2048  ;;  %v2660_v52 = vsel %vm1093_vm10, %v1036_v51, 0.0 }
 0x18f   : > { %v2051_v53 = vpop.eup %2050  ;;  %v980_v56 = vadd.f32 1.0, %v2049_v54  ;;  %1160 = vrot.lane.b32.xlu1 %v2660_v52, %s2237_s18  ;;  %v1938_v57 = vpop.f32.mrb[10].mxu0  ;;  %v2664_v58 = vsel %vm1093_vm10, %v1035_v24, 0.0 }
 0x190   : > { %v979_v59 = vadd.f32 1.0, %v2051_v53  ;;  %v2667_v55 = vadd.f32 %v1938_v57, %v2616_v13  ;;  %1158 = vrot.lane.b32.xlu0 %v2664_v58, %s2237_s18  ;;  %v837_v25 = vpop.f32.mrb[11].mxu0  ;;  %v1059_v57 = vadd.s32 6, %v2643_v35 }
 0x191   : > { %2060 = vrcp.f32 %v980_v56  ;;  %v2673_v63 = vadd.f32 %v2616_v13, %v837_v25 }
 0x192   : > { %2062 = vrcp.f32 %v979_v59  ;;  %v1822_v60 = vmul.f32 -1.442695, %v2667_v55  ;;  %v1837_v30 = vadd.s32 4294967295, %v1059_v57 }
 0x193   : > { %v2053_v0 = vpop.eup %2052  ;;  %v1821_v1 = vmul.f32 -1.442695, %v2673_v63 }
 0x194   : > { %v1038_v2 = vmul.f32 %v2053_v0, %v2621_v21  ;;  %2064 = vpow2.f32 %v1822_v60  ;;  %v2055_v7 = vpop.eup %2054  ;;  %vm1078_vm10 = vcmp.ge.s32.totalorder %v1837_v30, 0  ;;  %vm1088_vm11 = vcmp.lt.s32.totalorder %v1837_v30, 16 }
 0x195   : > { %2066 = vpow2.f32 %v1821_v1  ;;  %v1037_v14 = vmul.f32 %v2055_v7, %v2624_v4  ;;  %v1057_v4 = vadd.s32 4, %v2643_v35  ;;  %vm1098_vm12 = vmand %vm1078_vm10, %vm1088_vm11 }
 0x196   : > { %v2684_v9 = vsel %vm2677_vm13, %v1038_v2, 0.0  ;;  %v2057_v31 = vpop.eup %2056 }
 0x197   : > { %1210 = vrot.lane.b32.xlu1 %v2684_v9, %s2238_s7  ;;  %v1941_v15 = vpop.f32.mrb[12].mxu0  ;;  %v2059_v16 = vpop.eup %2058  ;;  %v982_v19 = vadd.f32 1.0, %v2057_v31  ;;  %v2694_v22 = vsel %vm2677_vm13, %v1037_v14, 0.0  ;;  %v1835_v11 = vadd.s32 4294967295, %v1057_v4  ;;  %v1060_v4 = vadd.s32 7, %v2643_v35 }
 0x198   : > { %v2690_v36 = vadd.f32 %v1941_v15, %v2616_v13  ;;  %v847_v20 = vpop.f32.mrb[13].mxu0  ;;  %v981_v21 = vadd.f32 1.0, %v2059_v16  ;;  %1208 = vrot.lane.b32.xlu0 %v2694_v22, %s2238_s7 }
 0x199   : > { %v2697_v6 = vadd.f32 %v2616_v13, %v847_v20  ;;  %2068 = vrcp.f32 %v982_v19  ;;  %vm1076_vm1 = vcmp.ge.s32.totalorder %v1835_v11, 0  ;;  %vm1086_vm2 = vcmp.lt.s32.totalorder %v1835_v11, 16 }
 0x19a   : > { %v1824_v12 = vmul.f32 -1.442695, %v2690_v36  ;;  %2070 = vrcp.f32 %v981_v21  ;;  %vm2729_vm3 = vmand %vm1076_vm1, %vm1086_vm2  ;;  %v1838_v11 = vadd.s32 4294967295, %v1060_v4 }
 0x19b   : > { %v2061_v37 = vpop.eup %2060  ;;  %v1823_v23 = vmul.f32 -1.442695, %v2697_v6  ;;  %1164 = vrot.lane.b32.xlu1 %v2684_v9, %s2237_s18 }
 0x19c   : > { %v2063_v26 = vpop.eup %2062  ;;  %v1040_v27 = vmul.f32 %v2061_v37, %v2629_v42  ;;  %2072 = vpow2.f32 %v1824_v12  ;;  %1162 = vrot.lane.b32.xlu0 %v2694_v22, %s2237_s18  ;;  %v1058_v42 = vadd.s32 5, %v2643_v35  ;;  %vm1079_vm13 = vcmp.ge.s32.totalorder %v1838_v11, 0 }
 0x19d   : > { %v1039_v28 = vmul.f32 %v2063_v26, %v2632_v29  ;;  %2074 = vpow2.f32 %v1823_v23  ;;  %vm1089_vm14 = vcmp.lt.s32.totalorder %v1838_v11, 16 }
 0x19e   : > { %v2065_v32 = vpop.eup %2064  ;;  %v2710_v17 = vsel %vm1095_vm0, %v1040_v27, 0.0  ;;  %v1836_v18 = vadd.s32 4294967295, %v1058_v42  ;;  %vm1099_vm15 = vmand %vm1079_vm13, %vm1089_vm14 }
 0x19f   : > { %v2067_v33 = vpop.eup %2066  ;;  %v984_v8 = vadd.f32 1.0, %v2065_v32  ;;  %1214 = vrot.lane.b32.xlu1 %v2710_v17, %s2238_s7  ;;  %v1944_v43 = vpop.f32.mrb[14].mxu0  ;;  %v2714_v34 = vsel %vm1095_vm0, %v1039_v28, 0.0 }
 0x1a0   : > { %v983_v38 = vadd.f32 1.0, %v2067_v33  ;;  %v2718_v29 = vadd.f32 %v1944_v43, %v2616_v13  ;;  %v857_v39 = vpop.f32.mrb[15].mxu0  ;;  %1212 = vrot.lane.b32.xlu0 %v2714_v34, %s2238_s7  ;;  %vm1077_vm4 = vcmp.ge.s32.totalorder %v1836_v18, 0  ;;  %vm1087_vm8 = vcmp.lt.s32.totalorder %v1836_v18, 16 }
 0x1a1   : > { %2076 = vrcp.f32 %v984_v8  ;;  %v2721_v48 = vadd.f32 %v2616_v13, %v857_v39  ;;  %vm1097_vm9 = vmand %vm1077_vm4, %vm1087_vm8 }
 0x1a2   : > { %2078 = vrcp.f32 %v983_v38  ;;  %v1826_v41 = vmul.f32 -1.442695, %v2718_v29 }
 0x1a3   : > { %v1825_v44 = vmul.f32 -1.442695, %v2721_v48  ;;  %1168 = vrot.lane.b32.xlu1 %v2710_v17, %s2237_s18  ;;  %v2069_v46 = vpop.eup %2068 }
 0x1a4   : > { %2080 = vpow2.f32 %v1826_v41  ;;  %v2071_v3 = vpop.eup %2070  ;;  %v1042_v47 = vmul.f32 %v2069_v46, %v2651_v40  ;;  %1166 = vrot.lane.b32.xlu0 %v2714_v34, %s2237_s18 }
 0x1a5   : > { %2082 = vpow2.f32 %v1825_v44  ;;  %v1041_v51 = vmul.f32 %v2071_v3, %v2656_v45 }
 0x1a6   : > { %v2073_v50 = vpop.eup %2072  ;;  %v2739_v53 = vsel %vm2729_vm3, %v1042_v47, 0.0 }
 0x1a7   : > { %v2075_v24 = vpop.eup %2074  ;;  %v986_v54 = vadd.f32 1.0, %v2073_v50  ;;  %v1947_v56 = vpop.f32.mrb[16].mxu0  ;;  %1218 = vrot.lane.b32.xlu1 %v2739_v53, %s2238_s7  ;;  %v2749_v45 = vsel %vm2729_vm3, %v1041_v51, 0.0 }
 0x1a8   : > { %v985_v59 = vadd.f32 1.0, %v2075_v24  ;;  %v2745_v40 = vadd.f32 %v1947_v56, %v2616_v13  ;;  %v867_v25 = vpop.f32.mrb[17].mxu0  ;;  %1216 = vrot.lane.b32.xlu0 %v2749_v45, %s2238_s7 }
 0x1a9   : > { %2084 = vrcp.f32 %v986_v54  ;;  %v2752_v62 = vadd.f32 %v2616_v13, %v867_v25 }
 0x1aa   : > { %2086 = vrcp.f32 %v985_v59  ;;  %v1828_v60 = vmul.f32 -1.442695, %v2745_v40 }
 0x1ab   : > { %v2077_v0 = vpop.eup %2076  ;;  %v1827_v1 = vmul.f32 -1.442695, %v2752_v62  ;;  %1172 = vrot.lane.b32.xlu1 %v2739_v53, %s2237_s18 }
 0x1ac   : > { %v2079_v2 = vpop.eup %2078  ;;  %v1044_v5 = vmul.f32 %v2077_v0, %v2667_v55  ;;  %2088 = vpow2.f32 %v1828_v60  ;;  %1170 = vrot.lane.b32.xlu0 %v2749_v45, %s2237_s18 }
 0x1ad   : > { %v1043_v7 = vmul.f32 %v2079_v2, %v2673_v63  ;;  %2090 = vpow2.f32 %v1827_v1 }
 0x1ae   : > { %v2081_v31 = vpop.eup %2080  ;;  %v2765_v14 = vsel %vm1097_vm9, %v1044_v5, 0.0  ;;  %v893_v5 = vadd.f32 %v2616_v13, %v2611_v10 }
 0x1af   : > { %v2083_v15 = vpop.eup %2082  ;;  %v988_v16 = vadd.f32 1.0, %v2081_v31  ;;  %v1950_v19 = vpop.f32.mrb[0].mxu1  ;;  %v2767_v20 = vsel %vm1097_vm9, %v1043_v7, 0.0  ;;  %1222 = vrot.lane.b32.xlu1 %v2765_v14, %s2238_s7  ;;  %v894_v7 = vadd.f32 %v2609_v61, %v2616_v13 }
 0x1b0   : > { %v987_v55 = vadd.f32 1.0, %v2083_v15  ;;  %v2770_v21 = vadd.f32 %v1950_v19, %v2616_v13  ;;  %v877_v63 = vpop.f32.mrb[1].mxu1  ;;  %1220 = vrot.lane.b32.xlu0 %v2767_v20, %s2238_s7  ;;  %v1811_v31 = vmul.f32 -1.442695, %v893_v5 }
 0x1b1   : > { %2092 = vrcp.f32 %v988_v16  ;;  %v2776_v12 = vadd.f32 %v2616_v13, %v877_v63  ;;  %v1812_v15 = vmul.f32 -1.442695, %v894_v7  ;;  %v1832_v63 = vadd.s32 4294967295, %v2643_v35 }
 0x1b2   : > { %2094 = vrcp.f32 %v987_v55  ;;  %v1830_v37 = vmul.f32 -1.442695, %v2770_v21 }
 0x1b3   : > { %v2085_v23 = vpop.eup %2084  ;;  %v1829_v26 = vmul.f32 -1.442695, %v2776_v12  ;;  %1176 = vrot.lane.b32.xlu1 %v2765_v14, %s2237_s18  ;;  %vm1072_vm9 = vcmp.ge.s32.totalorder %v1832_v63, 0  ;;  %vm1082_vm10 = vcmp.lt.s32.totalorder %v1832_v63, 16 }
 0x1b4   : > { %v2087_v27 = vpop.eup %2086  ;;  %v1046_v28 = vmul.f32 %v2085_v23, %v2690_v36  ;;  %2096 = vpow2.f32 %v1830_v37  ;;  %1174 = vrot.lane.b32.xlu0 %v2767_v20, %s2237_s18  ;;  %v1061_v36 = vadd.s32 8, %v2643_v35  ;;  %vm1092_vm11 = vmand %vm1072_vm9, %vm1082_vm10 }
 0x1b5   : > { %v1045_v32 = vmul.f32 %v2087_v27, %v2697_v6  ;;  %2098 = vpow2.f32 %v1829_v26 }
 0x1b6   : > { %v2089_v33 = vpop.eup %2088  ;;  %v2788_v8 = vsel %vm1098_vm12, %v1046_v28, 0.0  ;;  %v1839_v18 = vadd.s32 4294967295, %v1061_v36 }
 0x1b7   : > { %v2091_v43 = vpop.eup %2090  ;;  %v990_v42 = vadd.f32 1.0, %v2089_v33  ;;  %v2790_v38 = vsel %vm1098_vm12, %v1045_v32, 0.0  ;;  %1226 = vrot.lane.b32.xlu1 %v2788_v8, %s2238_s7 }
 0x1b8   : > { %v989_v39 = vadd.f32 1.0, %v2091_v43  ;;  %1224 = vrot.lane.b32.xlu0 %v2790_v38, %s2238_s7  ;;  %vm1080_vm0 = vcmp.ge.s32.totalorder %v1839_v18, 0  ;;  %vm1090_vm1 = vcmp.lt.s32.totalorder %v1839_v18, 16 }
 0x1b9   : > { %2100 = vrcp.f32 %v990_v42  ;;  %vm1100_vm2 = vmand %vm1080_vm0, %vm1090_vm1 }
 0x1ba   : > { %2102 = vrcp.f32 %v989_v39 }
 0x1bb   : > { %v2093_v6 = vpop.eup %2092  ;;  %1180 = vrot.lane.b32.xlu1 %v2788_v8, %s2237_s18 }
 0x1bc   : > { %v2095_v41 = vpop.eup %2094  ;;  %v1048_v44 = vmul.f32 %v2093_v6, %v2718_v29  ;;  %1178 = vrot.lane.b32.xlu0 %v2790_v38, %s2237_s18  ;;  %v1062_v29 = vadd.s32 9, %v2643_v35 }
 0x1bd   : > { %v1047_v46 = vmul.f32 %v2095_v41, %v2721_v48 }
 0x1be   : > { %v2097_v49 = vpop.eup %2096  ;;  %v2803_v3 = vsel %vm1099_vm15, %v1048_v44, 0.0  ;;  %v1840_v57 = vadd.s32 4294967295, %v1062_v29 }
 0x1bf   : > { %v2099_v47 = vpop.eup %2098  ;;  %v992_v50 = vadd.f32 1.0, %v2097_v49  ;;  %v2805_v51 = vsel %vm1099_vm15, %v1047_v46, 0.0  ;;  %1230 = vrot.lane.b32.xlu1 %v2803_v3, %s2238_s7 }
 0x1c0   : > { %v991_v24 = vadd.f32 1.0, %v2099_v47  ;;  %1228 = vrot.lane.b32.xlu0 %v2805_v51, %s2238_s7  ;;  %vm1081_vm3 = vcmp.ge.s32.totalorder %v1840_v57, 0  ;;  %vm1091_vm4 = vcmp.lt.s32.totalorder %v1840_v57, 16 }
 0x1c1   : > { %2104 = vrcp.f32 %v992_v50  ;;  %vm1101_vm8 = vmand %vm1081_vm3, %vm1091_vm4 }
 0x1c2   : > { %2106 = vrcp.f32 %v991_v24 }
 0x1c3   : > { %v2101_v48 = vpop.eup %2100  ;;  %1184 = vrot.lane.b32.xlu1 %v2803_v3, %s2237_s18  ;;  %2108 = vpow2.f32 %v1811_v31 }
 0x1c4   : > { %v2103_v54 = vpop.eup %2102  ;;  %v1050_v56 = vmul.f32 %v2101_v48, %v2745_v40  ;;  %1182 = vrot.lane.b32.xlu0 %v2805_v51, %s2237_s18  ;;  %2110 = vpow2.f32 %v1812_v15 }
 0x1c5   : > { %v1049_v59 = vmul.f32 %v2103_v54, %v2752_v62 }
 0x1c6   : > { %v1139_v25 = vsel %vm1100_vm2, %v1050_v56, 0.0 }
 0x1c7   : > { %v1138_v60 = vsel %vm1100_vm2, %v1049_v59, 0.0  ;;  %1234 = vrot.lane.b32.xlu1 %v1139_v25, %s2238_s7 }
 0x1c8   : > { %1232 = vrot.lane.b32.xlu0 %v1138_v60, %s2238_s7 }
 0x1cb   : > { %v2105_v0 = vpop.eup %2104  ;;  %1188 = vrot.lane.b32.xlu1 %v1139_v25, %s2237_s18 }
 0x1cc   : > { %v2107_v40 = vpop.eup %2106  ;;  %v1052_v1 = vmul.f32 %v2105_v0, %v2770_v21  ;;  %1186 = vrot.lane.b32.xlu0 %v1138_v60, %s2237_s18 }
 0x1cd   : > { %v1051_v62 = vmul.f32 %v2107_v40, %v2776_v12  ;;  %v2109_v16 = vpop.eup %2108 }
 0x1ce   : > { %v1141_v30 = vsel %vm1101_vm8, %v1052_v1, 0.0  ;;  %v2111_v19 = vpop.eup %2110  ;;  %v973_v55 = vadd.f32 1.0, %v2109_v16 }
 0x1cf   : > { %v1140_v2 = vsel %vm1101_vm8, %v1051_v62, 0.0  ;;  %1238 = vrot.lane.b32.xlu1 %v1141_v30, %s2238_s7  ;;  %v974_v21 = vadd.f32 1.0, %v2111_v19 }
 0x1d0   : > { %1236 = vrot.lane.b32.xlu0 %v1140_v2, %s2238_s7  ;;  %2112 = vrcp.f32 %v973_v55 }
 0x1d1   : > { %2114 = vrcp.f32 %v974_v21 }
 0x1da   : > { %v2113_v4 = vpop.eup %2112 }
 0x1db   : > { %v2115_v12 = vpop.eup %2114  ;;  %v1033_v37 = vmul.f32 %v2113_v4, %v893_v5 }
 0x1dc   : > { %v1034_v23 = vmul.f32 %v2115_v12, %v894_v7 }
 0x1dd   : > { %v1122_v26 = vsel %vm1092_vm11, %v1033_v37, 0.0 }
 0x1de   : > { %v1123_v27 = vsel %vm1092_vm11, %v1034_v23, 0.0 }
 0x201   : > { %v1161_v10 = vpop.permute.xlu1 %1160 }
 0x202   : > { %v1159_v61 = vpop.permute.xlu0 %1158  ;;  %v1257_v32 = vsel %vm612_vm5, %v1123_v27, %v1161_v10  ;;  %v2896_v27 = vld [vmem:[%s3029_s5] ss:$0 sm:$0xff] }
 0x203   : > { %v1256_v28 = vsel %vm612_vm5, %v1122_v26, %v1159_v61 }
 0x209   : > { %v1211_v13 = vpop.permute.xlu1 %1210 }
 0x20a   : > { %v1209_v11 = vpop.permute.xlu0 %1208  ;;  %v1273_v43 = vsel %vm633_vm6, %v1257_v32, %v1211_v13 }
 0x20b   : > { %v1272_v33 = vsel %vm633_vm6, %v1256_v28, %v1209_v11 }
 0x20c   : > { %1955 = vmatprep.mubr.msk.f32.mxu1 %vm656_vm7, %v1272_v33 }
 0x20d   : > { %v1165_v35 = vpop.permute.xlu1 %1164  ;;  %1956 = vmatmul.mubr.msk.f32.vlgmr.msra.gmra.mrb[2].mxu1 %vm656_vm7, %v1273_v43 }
 0x20e   : > { %v1163_v42 = vpop.permute.xlu0 %1162  ;;  %v1259_v41 = vsel %vm612_vm5, %v2660_v52, %v1165_v35 }
 0x20f   : > { %v1258_v36 = vsel %vm612_vm5, %v2664_v58, %v1163_v42 }
 0x211   : > { %v1215_v39 = vpop.permute.xlu1 %1214 }
 0x212   : > { %v1213_v6 = vpop.permute.xlu0 %1212  ;;  %v1275_v46 = vsel %vm633_vm6, %v1259_v41, %v1215_v39 }
 0x213   : > { %v1274_v44 = vsel %vm633_vm6, %v1258_v36, %v1213_v6 }
 0x214   : > { %1958 = vmatprep.mubr.msk.f32.mxu1 %vm656_vm7, %v1274_v44 }
 0x215   : > { %v1169_v18 = vpop.permute.xlu1 %1168  ;;  %1959 = vmatmul.mubr.msk.f32.gmra.mrb[4].mxu1 %vm656_vm7, %v1275_v46 }
 0x216   : > { %v1167_v49 = vpop.permute.xlu0 %1166  ;;  %v1261_v58 = vsel %vm612_vm5, %v2684_v9, %v1169_v18 }
 0x217   : > { %v1260_v50 = vsel %vm612_vm5, %v2694_v22, %v1167_v49 }
 0x219   : > { %v1219_v47 = vpop.permute.xlu1 %1218 }
 0x21a   : > { %v1217_v24 = vpop.permute.xlu0 %1216  ;;  %v1277_v29 = vsel %vm633_vm6, %v1261_v58, %v1219_v47 }
 0x21b   : > { %v1276_v52 = vsel %vm633_vm6, %v1260_v50, %v1217_v24 }
 0x21c   : > { %1961 = vmatprep.mubr.msk.f32.mxu1 %vm656_vm7, %v1276_v52 }
 0x21d   : > { %v1173_v48 = vpop.permute.xlu1 %1172  ;;  %1962 = vmatmul.mubr.msk.f32.gmra.mrb[6].mxu1 %vm656_vm7, %v1277_v29 }
 0x21e   : > { %v1171_v54 = vpop.permute.xlu0 %1170  ;;  %v1263_v22 = vsel %vm612_vm5, %v2710_v17, %v1173_v48 }
 0x21f   : > { %v1262_v57 = vsel %vm612_vm5, %v2714_v34, %v1171_v54 }
 0x221   : > { %v1223_v56 = vpop.permute.xlu1 %1222 }
 0x222   : > { %v1221_v59 = vpop.permute.xlu0 %1220  ;;  %v1279_v25 = vsel %vm633_vm6, %v1263_v22, %v1223_v56 }
 0x223   : > { %v1278_v9 = vsel %vm633_vm6, %v1262_v57, %v1221_v59 }
 0x224   : > { %1964 = vmatprep.mubr.msk.f32.mxu1 %vm656_vm7, %v1278_v9 }
 0x225   : > { %v1177_v60 = vpop.permute.xlu1 %1176  ;;  %1965 = vmatmul.mubr.msk.f32.gmra.mrb[8].mxu1 %vm656_vm7, %v1279_v25 }
 0x226   : > { %v1175_v0 = vpop.permute.xlu0 %1174  ;;  %v1265_v34 = vsel %vm612_vm5, %v2739_v53, %v1177_v60 }
 0x227   : > { %v1264_v1 = vsel %vm612_vm5, %v2749_v45, %v1175_v0 }
 0x229   : > { %v1227_v40 = vpop.permute.xlu1 %1226 }
 0x22a   : > { %v1225_v62 = vpop.permute.xlu0 %1224  ;;  %v1281_v30 = vsel %vm633_vm6, %v1265_v34, %v1227_v40 }
 0x22b   : > { %v1280_v17 = vsel %vm633_vm6, %v1264_v1, %v1225_v62 }
 0x22c   : > { %1967 = vmatprep.mubr.msk.f32.mxu1 %vm656_vm7, %v1280_v17  ;;  %v2180_v17 = vld [vmem:[%s2358_s30 + $0x8] sm:$0xff] }
 0x22d   : > { %v1181_v2 = vpop.permute.xlu1 %1180  ;;  %1968 = vmatmul.mubr.msk.f32.gmra.mrb[10].mxu1 %vm656_vm7, %v1281_v30 }
 0x22e   : > { %v1179_v5 = vpop.permute.xlu0 %1178  ;;  %v1267_v45 = vsel %vm612_vm5, %v2765_v14, %v1181_v2 }
 0x22f   : > { %v1266_v31 = vsel %vm612_vm5, %v2767_v20, %v1179_v5  ;;  %v2181_v5 = vld [vmem:[%s2358_s30] sm:$0xff] }
 0x231   : > { %v1231_v7 = vpop.permute.xlu1 %1230 }
 0x232   : > { %v1229_v15 = vpop.permute.xlu0 %1228  ;;  %v1283_v16 = vsel %vm633_vm6, %v1267_v45, %v1231_v7 }
 0x233   : > { %v1282_v53 = vsel %vm633_vm6, %v1266_v31, %v1229_v15 }
 0x234   : > { %1970 = vmatprep.mubr.msk.f32.mxu1 %vm656_vm7, %v1282_v53 }
 0x235   : > { %v1185_v19 = vpop.permute.xlu1 %1184  ;;  %1971 = vmatmul.mubr.msk.f32.gmra.mrb[12].mxu1 %vm656_vm7, %v1283_v16 }
 0x236   : > { %v1183_v55 = vpop.permute.xlu0 %1182  ;;  %v1269_v20 = vsel %vm612_vm5, %v2788_v8, %v1185_v19 }
 0x237   : > { %v1268_v63 = vsel %vm612_vm5, %v2790_v38, %v1183_v55 }
 0x239   : > { %v1235_v21 = vpop.permute.xlu1 %1234 }
 0x23a   : > { %v1233_v4 = vpop.permute.xlu0 %1232  ;;  %v1285_v12 = vsel %vm633_vm6, %v1269_v20, %v1235_v21 }
 0x23b   : > { %v1284_v14 = vsel %vm633_vm6, %v1268_v63, %v1233_v4 }
 0x23c   : > { %1973 = vmatprep.mubr.msk.f32.mxu1 %vm656_vm7, %v1284_v14 }
 0x23d   : > { %v1189_v10 = vpop.permute.xlu1 %1188  ;;  %1974 = vmatmul.mubr.msk.f32.gmra.mrb[14].mxu1 %vm656_vm7, %v1285_v12 }
 0x23e   : > { %v1187_v37 = vpop.permute.xlu0 %1186  ;;  %v1271_v38 = vsel %vm612_vm5, %v2803_v3, %v1189_v10  ;;  %v2182_v10 = vld [vmem:[%s2358_s30 + $0x18] sm:$0xff] }
 0x23f   : > { %v1270_v61 = vsel %vm612_vm5, %v2805_v51, %v1187_v37 }
 0x241   : > { %v1239_v23 = vpop.permute.xlu1 %1238 }
 0x242   : > { %v1237_v13 = vpop.permute.xlu0 %1236  ;;  %v1287_v26 = vsel %vm633_vm6, %v1271_v38, %v1239_v23 }
 0x243   : > { %v1286_v8 = vsel %vm633_vm6, %v1270_v61, %v1237_v13  ;;  %v2183_v61 = vld [vmem:[%s2358_s30 + $0x10] sm:$0xff] }
 0x244   : > { %1976 = vmatprep.mubr.msk.f32.mxu1 %vm656_vm7, %v1286_v8 }
 0x245   : > { %1977 = vmatmul.mubr.msk.f32.gmra.mrb[16].mxu1 %vm656_vm7, %v1287_v26 }
 0x2e0   : > { %v1957_v28 = vpop.f32.mrb[2].mxu1 }
 0x2e1   : > { %v1494_v51 = vadd.f32 %v1957_v28, %v2896_v27  ;;  %v1407_v11 = vpop.f32.mrb[3].mxu1 }
 0x2e2   : > { %v1493_v32 = vadd.f32 %v2896_v27, %v1407_v11 }
 0x2e3   : > { %v1860_v3 = vmul.f32 -1.442695, %v1494_v51 }
 0x2e4   : > { %v1859_v33 = vmul.f32 -1.442695, %v1493_v32 }
 0x2e5   : > { %2116 = vpow2.f32 %v1860_v3 }
 0x2e6   : > { %2118 = vpow2.f32 %v1859_v33 }
 0x2e8   : > { %v1960_v35 = vpop.f32.mrb[4].mxu1 }
 0x2e9   : > { %v1496_v43 = vadd.f32 %v1960_v35, %v2896_v27  ;;  %v1417_v42 = vpop.f32.mrb[5].mxu1 }
 0x2ea   : > { %v1495_v39 = vadd.f32 %v2896_v27, %v1417_v42 }
 0x2eb   : > { %v1862_v36 = vmul.f32 -1.442695, %v1496_v43 }
 0x2ec   : > { %v1861_v6 = vmul.f32 -1.442695, %v1495_v39 }
 0x2ed   : > { %2120 = vpow2.f32 %v1862_v36  ;;  %v2184_v36 = vld [vmem:[%s2358_s30 + $0x28] sm:$0xff] }
 0x2ee   : > { %2122 = vpow2.f32 %v1861_v6 }
 0x2ef   : > { %v2117_v41 = vpop.eup %2116 }
 0x2f0   : > { %v2119_v44 = vpop.eup %2118  ;;  %v1558_v18 = vadd.f32 1.0, %v2117_v41  ;;  %v1963_v46 = vpop.f32.mrb[6].mxu1 }
 0x2f1   : > { %v1557_v49 = vadd.f32 1.0, %v2119_v44  ;;  %v2903_v47 = vadd.f32 %v1963_v46, %v2896_v27  ;;  %v1427_v50 = vpop.f32.mrb[7].mxu1  ;;  %v2185_v44 = vld [vmem:[%s2358_s30 + $0x20] sm:$0xff] }
 0x2f2   : > { %2124 = vrcp.f32 %v1558_v18  ;;  %v2906_v24 = vadd.f32 %v2896_v27, %v1427_v50 }
 0x2f3   : > { %2126 = vrcp.f32 %v1557_v49  ;;  %v1864_v58 = vmul.f32 -1.442695, %v2903_v47 }
 0x2f4   : > { %v1863_v52 = vmul.f32 -1.442695, %v2906_v24 }
 0x2f5   : > { %2128 = vpow2.f32 %v1864_v58 }
 0x2f6   : > { %2130 = vpow2.f32 %v1863_v52 }
 0x2f7   : > { %v2121_v29 = vpop.eup %2120 }
 0x2f8   : > { %v2123_v48 = vpop.eup %2122  ;;  %v1560_v54 = vadd.f32 1.0, %v2121_v29  ;;  %v1966_v56 = vpop.f32.mrb[8].mxu1 }
 0x2f9   : > { %v1559_v57 = vadd.f32 1.0, %v2123_v48  ;;  %v2911_v59 = vadd.f32 %v1966_v56, %v2896_v27  ;;  %v1437_v22 = vpop.f32.mrb[9].mxu1 }
 0x2fa   : > { %2132 = vrcp.f32 %v1560_v54  ;;  %v2914_v9 = vadd.f32 %v2896_v27, %v1437_v22 }
 0x2fb   : > { %2134 = vrcp.f32 %v1559_v57  ;;  %v1866_v25 = vmul.f32 -1.442695, %v2911_v59 }
 0x2fc   : > { %v2125_v60 = vpop.eup %2124  ;;  %v1865_v0 = vmul.f32 -1.442695, %v2914_v9 }
 0x2fd   : > { %v2127_v40 = vpop.eup %2126  ;;  %v1606_v1 = vmul.f32 %v2125_v60, %v1494_v51  ;;  %2136 = vpow2.f32 %v1866_v25  ;;  %v2186_v25 = vld [vmem:[%s2358_s30 + $0x38] sm:$0xff] }
 0x2fe   : > { %v1605_v62 = vmul.f32 %v2127_v40, %v1493_v32  ;;  %2138 = vpow2.f32 %v1865_v0  ;;  %v2187_v40 = vld [vmem:[%s2358_s30 + $0x30] sm:$0xff] }
 0x2ff   : > { %v2129_v34 = vpop.eup %2128  ;;  %v1622_v30 = vadd.f32 %v2180_v17, %v1606_v1 }
 0x300   : > { %v2131_v2 = vpop.eup %2130  ;;  %v1621_v7 = vadd.f32 %v2181_v5, %v1605_v62  ;;  %v1562_v31 = vadd.f32 1.0, %v2129_v34  ;;  %v1969_v15 = vpop.f32.mrb[10].mxu1 }
 0x301   : > { %1638 = vst.msk [vmem:[%s2923_s17 + $0x8] sm:$0xff] %vm612_vm5, %v1622_v30  ;;  %v1561_v45 = vadd.f32 1.0, %v2131_v2  ;;  %v2930_v53 = vadd.f32 %v1969_v15, %v2896_v27  ;;  %v1447_v16 = vpop.f32.mrb[11].mxu1 }
 0x302   : > { %1637 = vst.msk [vmem:[%s2923_s17] sm:$0xff] %vm612_vm5, %v1621_v7  ;;  %2140 = vrcp.f32 %v1562_v31  ;;  %v2935_v19 = vadd.f32 %v2896_v27, %v1447_v16 }
 0x303   : > { %2142 = vrcp.f32 %v1561_v45  ;;  %v1868_v55 = vmul.f32 -1.442695, %v2930_v53 }
 0x304   : > { %v2133_v21 = vpop.eup %2132  ;;  %v1867_v63 = vmul.f32 -1.442695, %v2935_v19 }
 0x305   : > { %v2135_v4 = vpop.eup %2134  ;;  %v1608_v20 = vmul.f32 %v2133_v21, %v1496_v43  ;;  %2144 = vpow2.f32 %v1868_v55  ;;  %v2188_v55 = vld [vmem:[%s2358_s30 + $0x48] sm:$0xff] }
 0x306   : > { %v1607_v14 = vmul.f32 %v2135_v4, %v1495_v39  ;;  %2146 = vpow2.f32 %v1867_v63  ;;  %v2189_v4 = vld [vmem:[%s2358_s30 + $0x40] sm:$0xff] }
 0x307   : > { %v2137_v12 = vpop.eup %2136  ;;  %v1624_v37 = vadd.f32 %v2182_v10, %v1608_v20 }
 0x308   : > { %v2139_v23 = vpop.eup %2138  ;;  %v1623_v13 = vadd.f32 %v2183_v61, %v1607_v14  ;;  %v1564_v38 = vadd.f32 1.0, %v2137_v12  ;;  %v1972_v8 = vpop.f32.mrb[12].mxu1 }
 0x309   : > { %1640 = vst.msk [vmem:[%s2923_s17 + $0x18] sm:$0xff] %vm612_vm5, %v1624_v37  ;;  %v1563_v26 = vadd.f32 1.0, %v2139_v23  ;;  %v2944_v28 = vadd.f32 %v1972_v8, %v2896_v27  ;;  %v1457_v51 = vpop.f32.mrb[13].mxu1  ;;  %v2190_v23 = vld [vmem:[%s2358_s30 + $0x58] sm:$0xff] }
 0x30a   : > { %1639 = vst.msk [vmem:[%s2923_s17 + $0x10] sm:$0xff] %vm612_vm5, %v1623_v13  ;;  %2148 = vrcp.f32 %v1564_v38  ;;  %v2949_v11 = vadd.f32 %v2896_v27, %v1457_v51  ;;  %v2191_v38 = vld [vmem:[%s2358_s30 + $0x50] sm:$0xff] }
 0x30b   : > { %2150 = vrcp.f32 %v1563_v26  ;;  %v1870_v32 = vmul.f32 -1.442695, %v2944_v28 }
 0x30c   : > { %v2141_v3 = vpop.eup %2140  ;;  %v1869_v33 = vmul.f32 -1.442695, %v2949_v11 }
 0x30d   : > { %v2143_v35 = vpop.eup %2142  ;;  %v1610_v43 = vmul.f32 %v2141_v3, %v2903_v47  ;;  %2152 = vpow2.f32 %v1870_v32 }
 0x30e   : > { %v1609_v42 = vmul.f32 %v2143_v35, %v2906_v24  ;;  %2154 = vpow2.f32 %v1869_v33  ;;  %v2192_v33 = vld [vmem:[%s2358_s30 + $0x68] sm:$0xff] }
 0x30f   : > { %v2145_v39 = vpop.eup %2144  ;;  %v1626_v6 = vadd.f32 %v2184_v36, %v1610_v43  ;;  %v2193_v43 = vld [vmem:[%s2358_s30 + $0x60] sm:$0xff] }
 0x310   : > { %v2147_v41 = vpop.eup %2146  ;;  %v1625_v18 = vadd.f32 %v2185_v44, %v1609_v42  ;;  %v1566_v46 = vadd.f32 1.0, %v2145_v39  ;;  %v1975_v49 = vpop.f32.mrb[14].mxu1  ;;  %v2194_v44 = vld [vmem:[%s2358_s30 + $0x78] sm:$0xff] }
 0x311   : > { %1642 = vst.msk [vmem:[%s2923_s17 + $0x28] sm:$0xff] %vm612_vm5, %v1626_v6  ;;  %v1565_v50 = vadd.f32 1.0, %v2147_v41  ;;  %v2960_v58 = vadd.f32 %v1975_v49, %v2896_v27  ;;  %v1467_v47 = vpop.f32.mrb[15].mxu1 }
 0x312   : > { %1641 = vst.msk [vmem:[%s2923_s17 + $0x20] sm:$0xff] %vm612_vm5, %v1625_v18  ;;  %2156 = vrcp.f32 %v1566_v46  ;;  %v2965_v24 = vadd.f32 %v2896_v27, %v1467_v47  ;;  %v2195_v46 = vld [vmem:[%s2358_s30 + $0x70] sm:$0xff] }
 0x313   : > { %2158 = vrcp.f32 %v1565_v50  ;;  %v1872_v52 = vmul.f32 -1.442695, %v2960_v58 }
 0x314   : > { %v2149_v29 = vpop.eup %2148  ;;  %v1871_v48 = vmul.f32 -1.442695, %v2965_v24 }
 0x315   : > { %v2151_v54 = vpop.eup %2150  ;;  %v1612_v56 = vmul.f32 %v2149_v29, %v2911_v59  ;;  %2160 = vpow2.f32 %v1872_v52 }
 0x316   : > { %v1611_v57 = vmul.f32 %v2151_v54, %v2914_v9  ;;  %2162 = vpow2.f32 %v1871_v48 }
 0x317   : > { %v2153_v22 = vpop.eup %2152  ;;  %v1628_v60 = vadd.f32 %v2186_v25, %v1612_v56 }
 0x318   : > { %v2155_v0 = vpop.eup %2154  ;;  %v1627_v1 = vadd.f32 %v2187_v40, %v1611_v57  ;;  %v1568_v62 = vadd.f32 1.0, %v2153_v22  ;;  %v1978_v34 = vpop.f32.mrb[16].mxu1 }
 0x319   : > { %1644 = vst.msk [vmem:[%s2923_s17 + $0x38] sm:$0xff] %vm612_vm5, %v1628_v60  ;;  %v1567_v17 = vadd.f32 1.0, %v2155_v0  ;;  %v1508_v30 = vadd.f32 %v1978_v34, %v2896_v27  ;;  %v1477_v59 = vpop.f32.mrb[17].mxu1 }
 0x31a   : > { %1643 = vst.msk [vmem:[%s2923_s17 + $0x30] sm:$0xff] %vm612_vm5, %v1627_v1  ;;  %2164 = vrcp.f32 %v1568_v62  ;;  %v1507_v9 = vadd.f32 %v2896_v27, %v1477_v59 }
 0x31b   : > { %2166 = vrcp.f32 %v1567_v17  ;;  %v1874_v2 = vmul.f32 -1.442695, %v1508_v30 }
 0x31c   : > { %v2157_v5 = vpop.eup %2156  ;;  %v1873_v7 = vmul.f32 -1.442695, %v1507_v9 }
 0x31d   : > { %v2159_v31 = vpop.eup %2158  ;;  %v1614_v15 = vmul.f32 %v2157_v5, %v2930_v53  ;;  %2168 = vpow2.f32 %v1874_v2 }
 0x31e   : > { %v1613_v45 = vmul.f32 %v2159_v31, %v2935_v19  ;;  %2170 = vpow2.f32 %v1873_v7 }
 0x31f   : > { %v2161_v16 = vpop.eup %2160  ;;  %v1630_v21 = vadd.f32 %v2188_v55, %v1614_v15 }
 0x320   : > { %v2163_v63 = vpop.eup %2162  ;;  %v1629_v27 = vadd.f32 %v2189_v4, %v1613_v45  ;;  %v1570_v20 = vadd.f32 1.0, %v2161_v16 }
 0x321   : > { %1646 = vst.msk [vmem:[%s2923_s17 + $0x48] sm:$0xff] %vm612_vm5, %v1630_v21  ;;  %v1569_v14 = vadd.f32 1.0, %v2163_v63 }
 0x322   : > { %1645 = vst.msk [vmem:[%s2923_s17 + $0x40] sm:$0xff] %vm612_vm5, %v1629_v27  ;;  %2172 = vrcp.f32 %v1570_v20 }
 0x323   : > { %2174 = vrcp.f32 %v1569_v14 }
 0x324   : > { %v2165_v53 = vpop.eup %2164 }
 0x325   : > { %v2167_v19 = vpop.eup %2166  ;;  %v1616_v12 = vmul.f32 %v2165_v53, %v2944_v28 }
 0x326   : > { %v1615_v10 = vmul.f32 %v2167_v19, %v2949_v11 }
 0x327   : > { %v2169_v37 = vpop.eup %2168  ;;  %v1632_v61 = vadd.f32 %v2190_v23, %v1616_v12 }
 0x328   : > { %v2171_v13 = vpop.eup %2170  ;;  %v1631_v8 = vadd.f32 %v2191_v38, %v1615_v10  ;;  %v1572_v26 = vadd.f32 1.0, %v2169_v37 }
 0x329   : > { %1648 = vst.msk [vmem:[%s2923_s17 + $0x58] sm:$0xff] %vm612_vm5, %v1632_v61  ;;  %v1571_v51 = vadd.f32 1.0, %v2171_v13 }
 0x32a   : > { %1647 = vst.msk [vmem:[%s2923_s17 + $0x50] sm:$0xff] %vm612_vm5, %v1631_v8  ;;  %2176 = vrcp.f32 %v1572_v26 }
 0x32b   : > { %2178 = vrcp.f32 %v1571_v51 }
 0x32c   : > { %v2173_v28 = vpop.eup %2172 }
 0x32d   : > { %v2175_v11 = vpop.eup %2174  ;;  %v1618_v32 = vmul.f32 %v2173_v28, %v2960_v58 }
 0x32e   : > { %v1617_v3 = vmul.f32 %v2175_v11, %v2965_v24 }
 0x32f   : > { %v1634_v35 = vadd.f32 %v2192_v33, %v1618_v32 }
 0x330   : > { %v1633_v42 = vadd.f32 %v2193_v43, %v1617_v3 }
 0x331   : > { %1650 = vst.msk [vmem:[%s2923_s17 + $0x68] sm:$0xff] %vm612_vm5, %v1634_v35 }
 0x332   : > { %1649 = vst.msk [vmem:[%s2923_s17 + $0x60] sm:$0xff] %vm612_vm5, %v1633_v42 }
 0x334   : > { %v2177_v39 = vpop.eup %2176 }
 0x335   : > { %v2179_v36 = vpop.eup %2178  ;;  %v1620_v6 = vmul.f32 %v2177_v39, %v1508_v30 }
 0x336   : > { %v1619_v41 = vmul.f32 %v2179_v36, %v1507_v9 }
 0x337   : > { %v1636_v18 = vadd.f32 %v2194_v44, %v1620_v6 }
 0x338   : > { %v1635_v49 = vadd.f32 %v2195_v46, %v1619_v41 }
 0x339   : > { %1652 = vst.msk [vmem:[%s2923_s17 + $0x78] sm:$0xff] %vm612_vm5, %v1636_v18 }
 0x33a   : > { %1651 = vst.msk [vmem:[%s2923_s17 + $0x70] sm:$0xff] %vm612_vm5, %v1635_v49 }
 0x33b PF: > { %s16_s25 = sadd.s32 1, %s2234_s25   ;;  %s3037_s21 = smov %s2226_s23 }
 0x33c   : > { %p13_p8 = scmp.ge.s32.totalorder %s16_s25, 6   ;;  %s3038_s22 = smov %s2230_s24 }
 0x33d   : > { %s3039_s23 = smov %s3042_s26  ;;  %s3040_s24 = smov %s3046_s27 }
 0x33e   :  { %15 = sbr.rel (!%p13_p8) target bundleno = 3 (0x3), region = 77 }

</bundles_post_ra>
